<compile_context>
chip_gen: v6e
topology: v6e:2x2x1
jax: 0.10.0
libtpu: 0.0.40
codegen_flags: <defaults>
</compile_context>

<pallas_src>
import jax
import jax.numpy as jnp
from jax.experimental import pallas as pl
from jax.experimental.pallas import tpu as pltpu


# --------------------------------------------------------------------------- #
# helpers
# --------------------------------------------------------------------------- #
def _pick_rows(total, cap):
    """Row tile: multiple of 8 (or full dim), capped, >=2 grid steps if possible."""
    if total <= 8:
        return total
    half = ((pl.cdiv(total, 2) + 7) // 8) * 8          # ~total/2, sublane aligned
    full = ((total + 7) // 8) * 8
    return max(8, min(cap, half, full))


# --------------------------------------------------------------------------- #
# Kernel 1: conv3x3(valid) + bias + ReLU + 2x2 max-pool, fused.
# p_ref holds the four pool-position im2col groups packed on the lane axis:
#   [:, 0:k9] = (kh,kw) window at pool offset (0,0), then (0,1), (1,0), (1,1).
# --------------------------------------------------------------------------- #
def _conv_relu_pool_kernel(p_ref, w_ref, b_ref, o_ref):
    w = w_ref[...]                                   # (9*Cin, Cout)  bf16
    b = b_ref[...]                                   # (1, Cout)      f32
    k9 = w_ref.shape[0]
    x = p_ref[...]                                   # (tm, 4*9*Cin)  bf16

    def head(g):
        return jnp.dot(x[:, g * k9:(g + 1) * k9], w,
                       preferred_element_type=jnp.float32)

    pooled = jnp.maximum(jnp.maximum(head(0), head(1)),
                         jnp.maximum(head(2), head(3)))
    # bias is constant across the pool window and ReLU commutes with max,
    # so bias-then-ReLU after the max is exact.
    o_ref[...] = jnp.maximum(pooled + b, 0.0).astype(o_ref.dtype)


def conv_relu_pool(patches, w2d, b2d, *, out_dtype=jnp.bfloat16):
    mq, k36 = patches.shape                          # mq = N * Hp * Wp
    k9, cout = w2d.shape
    tm = _pick_rows(mq, 2048)
    return pl.pallas_call(
        _conv_relu_pool_kernel,
        out_shape=jax.ShapeDtypeStruct((mq, cout), out_dtype),
        grid=(pl.cdiv(mq, tm),),
        in_specs=[pl.BlockSpec((tm, k36), lambda i: (i, 0)),
                  pl.BlockSpec((k9, cout), lambda i: (0, 0)),
                  pl.BlockSpec((1, cout), lambda i: (0, 0))],
        out_specs=pl.BlockSpec((tm, cout), lambda i: (i, 0)),
        compiler_params=pltpu.CompilerParams(
            dimension_semantics=("parallel",)),
    )(patches, w2d, b2d)


# --------------------------------------------------------------------------- #
# Kernel 2: Linear(dim,512) + ReLU + Linear(512, ncp) fused tail.
# Weights are VMEM-resident (constant index_map); classifier width padded to
# a lane-dense 128 so the output store is unmasked.
# --------------------------------------------------------------------------- #
def _mlp_head_kernel(x_ref, lw_ref, lb_ref, fw_ref, fb_ref, o_ref):
    h = jnp.dot(x_ref[...], lw_ref[...], preferred_element_type=jnp.float32)
    rep = jnp.maximum(h + lb_ref[...], 0.0)                       # (tn, 512) f32
    out = jnp.dot(rep.astype(fw_ref.dtype), fw_ref[...],
                  preferred_element_type=jnp.float32) + fb_ref[...]
    o_ref[...] = out.astype(o_ref.dtype)


def mlp_head(flat, lin_wt, lin_b, fc_wt_pad, fc_b_pad, *, num_classes):
    n, d = flat.shape
    hid = lin_wt.shape[1]
    ncp = fc_wt_pad.shape[1]
    tn = _pick_rows(n, 512)
    logits_pad = pl.pallas_call(
        _mlp_head_kernel,
        out_shape=jax.ShapeDtypeStruct((n, ncp), jnp.float32),
        grid=(pl.cdiv(n, tn),),
        in_specs=[pl.BlockSpec((tn, d), lambda i: (i, 0)),
                  pl.BlockSpec((d, hid), lambda i: (0, 0)),
                  pl.BlockSpec((1, hid), lambda i: (0, 0)),
                  pl.BlockSpec((hid, ncp), lambda i: (0, 0)),
                  pl.BlockSpec((1, ncp), lambda i: (0, 0))],
        out_specs=pl.BlockSpec((tn, ncp), lambda i: (i, 0)),
        compiler_params=pltpu.CompilerParams(
            dimension_semantics=("parallel",)),
    )(flat, lin_wt, lin_b, fc_wt_pad, fc_b_pad)
    return logits_pad[:, :num_classes]


# ------------------------------- XLA glue ---------------------------------- #
def _pool_group_patches(x):
    """Lane-packed im2col: (N,Cin,H,W) f32 -> (N*Hp*Wp, 4*9*Cin) bf16.

    Column order: pool position (a,b) in {(0,0),(0,1),(1,0),(1,1)} outer,
    then (ci, kh, kw) inner — matching conv_w2d's row order per group.
    """
    n, cin, h, w = x.shape
    hp, wp = (h - 2) // 2, (w - 2) // 2
    groups = []
    for a in (0, 1):
        for b in (0, 1):
            taps = [x[:, ci,
                      a + kh: a + kh + 2 * hp: 2,
                      b + kw: b + kw + 2 * wp: 2]            # (N, Hp, Wp)
                    for ci in range(cin)
                    for kh in range(3)
                    for kw in range(3)]
            g = jnp.stack(taps, axis=-1)                     # (N, Hp, Wp, 9Cin)
            groups.append(g.reshape(n * hp * wp, cin * 9))
    return jnp.concatenate(groups, axis=-1).astype(jnp.bfloat16)


# ------------------------------ model wrapper ------------------------------ #
def fedavg_cnn_student_forward(x_nchw, p, *, num_classes):
    """FedAvgCNNStudent.forward: x (N, Cin, H, W) -> logits (N, num_classes)."""
    n, _, h, w = x_nchw.shape
    hp, wp = (h - 2) // 2, (w - 2) // 2
    cout = p["conv_w2d"].shape[1]

    patches = _pool_group_patches(x_nchw.astype(jnp.float32))
    pooled = conv_relu_pool(patches, p["conv_w2d"], p["conv_b"])  # (N*Hp*Wp, Cout)
    # Free row-major collapse; per-sample element order is (hp, wp, c), which
    # is exactly what the pre-permuted lin_wT expects.
    flat = pooled.reshape(n, hp * wp * cout)
    return mlp_head(flat, p["lin_wT"], p["lin_b"], p["fc_wT"], p["fc_b"],
                    num_classes=num_classes)


def prepare_params(raw, *, hp, wp, lane=128):
    """One-time, outside-jit weight repacking (flatten order + lane padding)."""
    cw = raw["conv_w"]                                   # (Cout, Cin, 3, 3)
    cout = cw.shape[0]
    conv_w2d = jnp.transpose(cw.reshape(cout, -1)).astype(jnp.bfloat16)
    conv_b = raw["conv_b"].reshape(1, cout).astype(jnp.float32)

    lw = raw["lin_w"]                                    # (512, dim) torch layout
    hid = lw.shape[0]
    # torch Flatten on NCHW orders columns as (c, hp, wp); our activation is
    # (hp, wp, c) -> permute weight rows once here, no runtime transpose.
    lin_wt = jnp.transpose(lw.reshape(hid, cout, hp, wp),
                           (2, 3, 1, 0)).reshape(hp * wp * cout, hid)

    fc_w = raw["fc_w"]                                   # (nc, 512) torch layout
    nc = fc_w.shape[0]
    ncp = ((nc + lane - 1) // lane) * lane
    fc_wt_pad = jnp.zeros((hid, ncp), jnp.bfloat16)
    fc_wt_pad = fc_wt_pad.at[:, :nc].set(jnp.transpose(fc_w).astype(jnp.bfloat16))
    fc_b_pad = jnp.zeros((1, ncp), jnp.float32)
    fc_b_pad = fc_b_pad.at[:, :nc].set(raw["fc_b"].astype(jnp.float32))

    return {
        "conv_w2d": conv_w2d,
        "conv_b": conv_b,
        "lin_wT": lin_wt.astype(jnp.bfloat16),
        "lin_b": raw["lin_b"].reshape(1, hid).astype(jnp.float32),
        "fc_wT": fc_wt_pad,
        "fc_b": fc_b_pad,
    }


def init_params(key, *, in_features=1, num_classes=10, dim=2048):
    """Deterministic synthetic init (PyTorch-default-style uniform bounds)."""
    def uni(k, shape, fan_in):
        bound = 1.0 / float(fan_in) ** 0.5
        return jax.random.uniform(k, shape, jnp.float32, -bound, bound)

    ks = jax.random.split(key, 6)
    return {
        "conv_w": uni(ks[0], (32, in_features, 3, 3), in_features * 9),
        "conv_b": uni(ks[1], (32,), in_features * 9),
        "lin_w": uni(ks[2], (512, dim), dim),
        "lin_b": uni(ks[3], (512,), dim),
        "fc_w": uni(ks[4], (num_classes, 512), 512),
        "fc_b": uni(ks[5], (num_classes,), 512),
    }


if __name__ == "__main__":
    key = jax.random.PRNGKey(0)
    kx, kp = jax.random.split(key)

    # Small shapes consistent with the module: Conv(k=3, pad=0) + MaxPool(2)
    # on 18x18 gives 8x8x32 -> dim = 2048 for nn.Linear(dim, 512).
    N, CIN, H, W = 2, 1, 18, 18
    NUM_CLASSES = 10
    HP, WP = (H - 2) // 2, (W - 2) // 2
    DIM = 32 * HP * WP

    x = jax.random.normal(kx, (N, CIN, H, W), jnp.float32)   # NCHW like torch
    raw_params = init_params(kp, in_features=CIN, num_classes=NUM_CLASSES,
                             dim=DIM)
    params = prepare_params(raw_params, hp=HP, wp=WP)

    fwd = jax.jit(fedavg_cnn_student_forward, static_argnames=("num_classes",))
    out = fwd(x, params, num_classes=NUM_CLASSES)
    jax.block_until_ready(out)
    assert out.shape == (N, NUM_CLASSES) and out.dtype == jnp.float32
    print("KERNEL_OK")
</pallas_src>

<mosaic_0001>
module attributes {stable_mosaic.version = 11 : i64} {
  func.func @_conv_relu_pool_kernel(%arg0: i32, %arg1: memref<64x36xbf16, #tpu.memory_space<vmem>>, %arg2: memref<9x32xbf16, #tpu.memory_space<vmem>>, %arg3: memref<1x32xf32, #tpu.memory_space<vmem>>, %arg4: memref<64x32xbf16, #tpu.memory_space<vmem>>) attributes {dimension_semantics = [#tpu.dimension_semantics<parallel>], iteration_bounds = array<i64: 2>, scalar_prefetch = 0 : i64, scratch_operands = 0 : i64, tpu.core_type = #tpu.core_type<tc>, window_params = [{transform_indices = @transform_0, window_bounds = array<i64: 64, 36>}, {pipeline_mode = #tpu.pipeline_mode<synchronous>, transform_indices = @transform_1, window_bounds = array<i64: 9, 32>}, {pipeline_mode = #tpu.pipeline_mode<synchronous>, transform_indices = @transform_2, window_bounds = array<i64: 1, 32>}, {transform_indices = @transform_3, window_bounds = array<i64: 64, 32>}]} {
    %c0 = arith.constant 0 : index
    %c0_0 = arith.constant 0 : index
    %0 = vector.load %arg2[%c0, %c0_0] : memref<9x32xbf16, #tpu.memory_space<vmem>>, vector<9x32xbf16>
    %c0_1 = arith.constant 0 : index
    %c0_2 = arith.constant 0 : index
    %1 = vector.load %arg3[%c0_1, %c0_2] : memref<1x32xf32, #tpu.memory_space<vmem>>, vector<1x32xf32>
    %c0_3 = arith.constant 0 : index
    %c0_4 = arith.constant 0 : index
    %2 = vector.load %arg1[%c0_3, %c0_4] : memref<64x36xbf16, #tpu.memory_space<vmem>>, vector<64x36xbf16>
    %3 = vector.extract_strided_slice %2 {offsets = [0, 0], sizes = [64, 9], strides = [1, 1]} : vector<64x36xbf16> to vector<64x9xbf16>
    %cst = arith.constant dense<0.000000e+00> : vector<64x32xf32>
    %4 = tpu.matmul %3, %0, %cst {dimension_numbers = #tpu.dot_dimension_numbers<[1], [0], [0], [1], [0, 0, 1, 1], [], []>} : vector<64x9xbf16>, vector<9x32xbf16>, vector<64x32xf32> -> vector<64x32xf32>
    %5 = vector.extract_strided_slice %2 {offsets = [0, 9], sizes = [64, 9], strides = [1, 1]} : vector<64x36xbf16> to vector<64x9xbf16>
    %cst_5 = arith.constant dense<0.000000e+00> : vector<64x32xf32>
    %6 = tpu.matmul %5, %0, %cst_5 {dimension_numbers = #tpu.dot_dimension_numbers<[1], [0], [0], [1], [0, 0, 1, 1], [], []>} : vector<64x9xbf16>, vector<9x32xbf16>, vector<64x32xf32> -> vector<64x32xf32>
    %7 = arith.maximumf %4, %6 : vector<64x32xf32>
    %8 = vector.extract_strided_slice %2 {offsets = [0, 18], sizes = [64, 9], strides = [1, 1]} : vector<64x36xbf16> to vector<64x9xbf16>
    %cst_6 = arith.constant dense<0.000000e+00> : vector<64x32xf32>
    %9 = tpu.matmul %8, %0, %cst_6 {dimension_numbers = #tpu.dot_dimension_numbers<[1], [0], [0], [1], [0, 0, 1, 1], [], []>} : vector<64x9xbf16>, vector<9x32xbf16>, vector<64x32xf32> -> vector<64x32xf32>
    %10 = vector.extract_strided_slice %2 {offsets = [0, 27], sizes = [64, 9], strides = [1, 1]} : vector<64x36xbf16> to vector<64x9xbf16>
    %cst_7 = arith.constant dense<0.000000e+00> : vector<64x32xf32>
    %11 = tpu.matmul %10, %0, %cst_7 {dimension_numbers = #tpu.dot_dimension_numbers<[1], [0], [0], [1], [0, 0, 1, 1], [], []>} : vector<64x9xbf16>, vector<9x32xbf16>, vector<64x32xf32> -> vector<64x32xf32>
    %12 = arith.maximumf %9, %11 : vector<64x32xf32>
    %13 = arith.maximumf %7, %12 : vector<64x32xf32>
    %14 = vector.broadcast %1 : vector<1x32xf32> to vector<64x32xf32>
    %15 = arith.addf %13, %14 : vector<64x32xf32>
    %cst_8 = arith.constant 0.000000e+00 : f32
    %16 = vector.broadcast %cst_8 : f32 to vector<64x32xf32>
    %17 = arith.maximumf %15, %16 : vector<64x32xf32>
    %18 = arith.truncf %17 : vector<64x32xf32> to vector<64x32xbf16>
    %c0_9 = arith.constant 0 : index
    %c0_10 = arith.constant 0 : index
    %19 = vector.load %arg4[%c0_9, %c0_10] : memref<64x32xbf16, #tpu.memory_space<vmem>>, vector<64x32xbf16>
    tpu.vector_store %arg4[%c0_9, %c0_10], %18 {strides = array<i32>} : memref<64x32xbf16, #tpu.memory_space<vmem>>, vector<64x32xbf16>,
    return
  }
  func.func @transform_0(%arg0: i32) -> (i32, i32) {
    %c0_i32 = arith.constant 0 : i32
    %c0_i32_0 = arith.constant 0 : i32
    return %arg0, %c0_i32 : i32, i32
  }
  func.func @transform_1(%arg0: i32) -> (i32, i32) {
    %c0_i32 = arith.constant 0 : i32
    %c0_i32_0 = arith.constant 0 : i32
    %c0_i32_1 = arith.constant 0 : i32
    return %c0_i32, %c0_i32_0 : i32, i32
  }
  func.func @transform_2(%arg0: i32) -> (i32, i32) {
    %c0_i32 = arith.constant 0 : i32
    %c0_i32_0 = arith.constant 0 : i32
    %c0_i32_1 = arith.constant 0 : i32
    return %c0_i32, %c0_i32_0 : i32, i32
  }
  func.func @transform_3(%arg0: i32) -> (i32, i32) {
    %c0_i32 = arith.constant 0 : i32
    %c0_i32_0 = arith.constant 0 : i32
    return %arg0, %c0_i32 : i32, i32
  }
}

module attributes {stable_mosaic.version = 11 : i64} {
  func.func @_mlp_head_kernel(%arg0: i32, %arg1: memref<2x2048xbf16, #tpu.memory_space<vmem>>, %arg2: memref<2048x512xbf16, #tpu.memory_space<vmem>>, %arg3: memref<1x512xf32, #tpu.memory_space<vmem>>, %arg4: memref<512x128xbf16, #tpu.memory_space<vmem>>, %arg5: memref<1x128xf32, #tpu.memory_space<vmem>>, %arg6: memref<2x128xf32, #tpu.memory_space<vmem>>) attributes {dimension_semantics = [#tpu.dimension_semantics<parallel>], iteration_bounds = array<i64: 1>, scalar_prefetch = 0 : i64, scratch_operands = 0 : i64, tpu.core_type = #tpu.core_type<tc>, window_params = [{transform_indices = @transform_0, window_bounds = array<i64: 2, 2048>}, {pipeline_mode = #tpu.pipeline_mode<synchronous>, transform_indices = @transform_1, window_bounds = array<i64: 2048, 512>}, {pipeline_mode = #tpu.pipeline_mode<synchronous>, transform_indices = @transform_2, window_bounds = array<i64: 1, 512>}, {pipeline_mode = #tpu.pipeline_mode<synchronous>, transform_indices = @transform_3, window_bounds = array<i64: 512, 128>}, {pipeline_mode = #tpu.pipeline_mode<synchronous>, transform_indices = @transform_4, window_bounds = array<i64: 1, 128>}, {transform_indices = @transform_5, window_bounds = array<i64: 2, 128>}]} {
    %c0 = arith.constant 0 : index
    %c0_0 = arith.constant 0 : index
    %0 = vector.load %arg1[%c0, %c0_0] : memref<2x2048xbf16, #tpu.memory_space<vmem>>, vector<2x2048xbf16>
    %c0_1 = arith.constant 0 : index
    %c0_2 = arith.constant 0 : index
    %1 = vector.load %arg2[%c0_1, %c0_2] : memref<2048x512xbf16, #tpu.memory_space<vmem>>, vector<2048x512xbf16>
    %cst = arith.constant dense<0.000000e+00> : vector<2x512xf32>
    %2 = tpu.matmul %0, %1, %cst {dimension_numbers = #tpu.dot_dimension_numbers<[1], [0], [0], [1], [0, 0, 1, 1], [], []>} : vector<2x2048xbf16>, vector<2048x512xbf16>, vector<2x512xf32> -> vector<2x512xf32>
    %c0_3 = arith.constant 0 : index
    %c0_4 = arith.constant 0 : index
    %3 = vector.load %arg3[%c0_3, %c0_4] : memref<1x512xf32, #tpu.memory_space<vmem>>, vector<1x512xf32>
    %4 = vector.broadcast %3 : vector<1x512xf32> to vector<2x512xf32>
    %5 = arith.addf %2, %4 : vector<2x512xf32>
    %cst_5 = arith.constant 0.000000e+00 : f32
    %6 = vector.broadcast %cst_5 : f32 to vector<2x512xf32>
    %7 = arith.maximumf %5, %6 : vector<2x512xf32>
    %8 = arith.truncf %7 : vector<2x512xf32> to vector<2x512xbf16>
    %c0_6 = arith.constant 0 : index
    %c0_7 = arith.constant 0 : index
    %9 = vector.load %arg4[%c0_6, %c0_7] : memref<512x128xbf16, #tpu.memory_space<vmem>>, vector<512x128xbf16>
    %cst_8 = arith.constant dense<0.000000e+00> : vector<2x128xf32>
    %10 = tpu.matmul %8, %9, %cst_8 {dimension_numbers = #tpu.dot_dimension_numbers<[1], [0], [0], [1], [0, 0, 1, 1], [], []>} : vector<2x512xbf16>, vector<512x128xbf16>, vector<2x128xf32> -> vector<2x128xf32>
    %c0_9 = arith.constant 0 : index
    %c0_10 = arith.constant 0 : index
    %11 = vector.load %arg5[%c0_9, %c0_10] : memref<1x128xf32, #tpu.memory_space<vmem>>, vector<1x128xf32>
    %12 = vector.broadcast %11 : vector<1x128xf32> to vector<2x128xf32>
    %13 = arith.addf %10, %12 : vector<2x128xf32>
    %c0_11 = arith.constant 0 : index
    %c0_12 = arith.constant 0 : index
    %14 = vector.load %arg6[%c0_11, %c0_12] : memref<2x128xf32, #tpu.memory_space<vmem>>, vector<2x128xf32>
    tpu.vector_store %arg6[%c0_11, %c0_12], %13 {strides = array<i32>} : memref<2x128xf32, #tpu.memory_space<vmem>>, vector<2x128xf32>,
    return
  }
  func.func @transform_0(%arg0: i32) -> (i32, i32) {
    %c0_i32 = arith.constant 0 : i32
    %c0_i32_0 = arith.constant 0 : i32
    return %arg0, %c0_i32 : i32, i32
  }
  func.func @transform_1(%arg0: i32) -> (i32, i32) {
    %c0_i32 = arith.constant 0 : i32
    %c0_i32_0 = arith.constant 0 : i32
    %c0_i32_1 = arith.constant 0 : i32
    return %c0_i32, %c0_i32_0 : i32, i32
  }
  func.func @transform_2(%arg0: i32) -> (i32, i32) {
    %c0_i32 = arith.constant 0 : i32
    %c0_i32_0 = arith.constant 0 : i32
    %c0_i32_1 = arith.constant 0 : i32
    return %c0_i32, %c0_i32_0 : i32, i32
  }
  func.func @transform_3(%arg0: i32) -> (i32, i32) {
    %c0_i32 = arith.constant 0 : i32
    %c0_i32_0 = arith.constant 0 : i32
    %c0_i32_1 = arith.constant 0 : i32
    return %c0_i32, %c0_i32_0 : i32, i32
  }
  func.func @transform_4(%arg0: i32) -> (i32, i32) {
    %c0_i32 = arith.constant 0 : i32
    %c0_i32_0 = arith.constant 0 : i32
    %c0_i32_1 = arith.constant 0 : i32
    return %c0_i32, %c0_i32_0 : i32, i32
  }
  func.func @transform_5(%arg0: i32) -> (i32, i32) {
    %c0_i32 = arith.constant 0 : i32
    %c0_i32_0 = arith.constant 0 : i32
    return %arg0, %c0_i32 : i32, i32
  }
}

</mosaic_0001>

<bundles_post_ra>
// kernel: fedavg_cnn_student_forward.2
= control target key start
LH: loop header
LB: loop body
LE: loop exit
PB: predicated region body
PF: predicated region fallthrough
CT: control target
= control target key end

     0   :  { %8 = vsyncpa [#allocation3], 0  ;;  %s1105_s0 = inlined_call_operand.vmem [shape: bf16[128,36], index: 0, kind: input, shape index: {}]   ;;  %s1106_s1 = inlined_call_operand.hbm [shape: bf16[9,32], index: 1, kind: input, shape index: {}]   ;;  %s1107_s2 = inlined_call_operand.hbm [shape: f32[1,32], index: 2, kind: input, shape index: {}]   ;;  %s1108_s3 = inlined_call_operand.vmem [shape: bf16[128,32], index: 3, kind: output, shape index: {}]  }
   0x1   :  { %9 = vsyncpa [#allocation5], 0  ;;  %s993_s12 = smov 0  }
   0x2 LB: > { %s744_s13 = sadd.s32 4294967295, %s963_s12   ;;  %p746_p0 = scmp.ge.s32.totalorder %s963_s12, 1  ;;  %s963_s12 = sphi %s993_s12, %s15_s12  }
   0x3   : > { %p114_p1 = scmp.lt.s32.totalorder %s963_s12, 3  ;;  %s965_s14 = smov [#allocation2]  }
   0x4   : > { %s126_s15 = sshll.u32 %s965_s14, 4  ;;  %p1007_p3 = scmp.eq.s32.totalorder %s744_s13, 0  ;;  %s127_s15 = int_to_ptr.vmem [resolvable:$true] %s126_s15 }
   0x5   : > { %p1001_p2 = pnand %p746_p0, %p114_p1  ;;  %s966_s18 = smov [#allocation4]  }
   0x6   : > { %s140_s19 = sshll.u32 %s966_s18, 4  ;;  %s908_s21 = scalar_lea.vmem %s127_s15, 128  ;;  %s141_s19 = int_to_ptr.vmem [resolvable:$true] %s140_s19 }
   0x7   : > { %p865_p4 = pneg %p1001_p2  ;;  %p909_p7 = scmp.ne.s32.totalorder %s127_s15, %s908_s21 }
   0x8   : > { %p916_p10 = scmp.lt.s32.totalorder %s127_s15, %s127_s15  ;;  %p917_p11 = scmp.lt.s32.totalorder %s908_s21, %s908_s21 }
   0x9   : > { %p1015_p5 = pnand %p1007_p3, %p865_p4 }
   0xa   : > { %p918_p12 = por %p917_p11, %p916_p10 }
   0xb   : > { %p899_p6 = pneg %p1015_p5 }
   0xd   : > { %p911_p8 = pnand %p909_p7, %p899_p6 }
   0xf   : > { %p912_p9 = pneg %p911_p8 }
  0x11   : > { %p919_p13 = pnand %p918_p12, %p912_p9 }
  0x13   : > { %922 = shalt.err (!%p919_p13)
}
  0x14   : > { %s967_s22 = smov 64   ;;  %s968_s23 = smov 4  }
  0x15   : > { %868 = dma.hbm_to_vmem [thread:$0]  (!%p1015_p5), %s1106_s1, 128, %s127_s15, [#allocation3], %s967_s22, %s967_s22, %s968_s23  }
  0x16   : > { %s934_s26 = scalar_lea.vmem %s141_s19, 16  ;;  %s941_s27 = scalar_lea.vmem %s141_s19, 32 }
  0x17   : > { %p935_p0 = scmp.ne.s32.totalorder %s141_s19, %s934_s26  ;;  %p942_p7 = scmp.lt.s32.totalorder %s141_s19, %s141_s19 }
  0x18   : > { %p943_p8 = scmp.lt.s32.totalorder %s941_s27, %s934_s26 }
  0x19   : > { %p937_p1 = pnand %p935_p0, %p899_p6 }
  0x1a   : > { %p944_p9 = por %p943_p8, %p942_p7 }
  0x1b   : > { %p938_p4 = pneg %p937_p1 }
  0x1d   : > { %p945_p10 = pnand %p944_p9, %p938_p4 }
  0x1f   : > { %948 = shalt.err (!%p945_p10)
}
  0x20   : > { %871 = dma.hbm_to_vmem [thread:$0]  (!%p1015_p5), %s1107_s2, 16, %s141_s19, [#allocation5]  }
  0x21   : > { %162 = sbr.rel (%p1001_p2) target bundleno = 401 (0x191), region = 32 }
  0x26   : > { %954 = dma.done.wait (%p1007_p3), [#allocation3], 128  }
  0x27   : > { %956 = vsyncadd (%p1007_p3), [#allocation3], 4294967168 }
  0x28   : > { %958 = dma.done.wait (%p1007_p3), [#allocation5], 16  }
  0x29   : > { %960 = vsyncadd (%p1007_p3), [#allocation5], 4294967280  ;;  %s753_s30 = sshll.u32 %s744_s13, 3  ;;  %vm252_vm0 = vcmask 1043456   ;;  %vm253_vm1 = vcmask 1044480   ;;  %vm239_vm2 = vcmask 72704  }
  0x2a   : > { %p191_p6 = scmp.lt.s32.totalorder %s753_s30, 15  ;;  %v969_v1 = vmov 65535   ;;  %s970_s8 = smov 119   ;;  %v896_v7 = vld [vmem:[#allocation2] sm:$0x1f]   ;;  %vm657_vm3 = vcmask 257024  }
  0x2b   : > { %v254_v2 = vsel %vm252_vm0, 4294967295, %v969_v1  ;;  %s971_s9 = smov 110   ;;  %s972_s10 = smov 101   ;;  %v778_v44 = vld [vmem:[#allocation4] ss:$0 sm:$0xff] }
  0x2c   : > { %s1113_s30 = smov (!%p191_p6, %s753_s30), 15  ;;  %v255_v6 = vsel %vm253_vm1, %v254_v2, 0 }
  0x2d   : > { %s754_s4 = sshll.u32 %s1113_s30, 2  ;;  %v257_v8 = vand.u32 %v896_v7, %v255_v6 }
  0x2e   : > { %s194_s7 = scalar_lea.vmem %s1105_s0, %s754_s4  ;;  %s1082_s14 = scalar_lea.vmem %s1108_s3, %s754_s4 }
  0x2f   : > { %v892_v0 = vld [vmem:[%s194_s7] sm:$0xff]   ;;  %v893_v3 = vld [vmem:[%s194_s7 + $0x8] sm:$0xff]   ;;  %v894_v4 = vld [vmem:[%s194_s7 + $0x10] sm:$0xff]   ;;  %817 = vmatprep.subr.bf16.mxu0 %v257_v8  ;;  %827 = vmatprep.subr.bf16.mxu1 %v257_v8 }
  0x30   : > { %324 = vrot.lane.b32.xlu0 %v892_v0, %s970_s8  ;;  %819 = vmatprep.mubr.msk.bf16.mxu0 %vm239_vm2, %v892_v0  ;;  %v895_v5 = vld [vmem:[%s194_s7 + $0x18] sm:$0xff]  }
  0x31   : > { %328 = vrot.lane.b32.xlu1 %v894_v4, %s970_s8  ;;  %818 = vmatpush3.bf16.msra.mxu0 %v257_v8 }
  0x32   : > { %828 = vmatpush3.bf16.msra.mxu1 %v257_v8  ;;  %837 = vmatprep.subr.bf16.mxu0 %v257_v8 }
  0x33   : > { %847 = vmatprep.subr.bf16.mxu1 %v257_v8 }
  0x34   : > { %326 = vrot.lane.b32.xlu0 %v893_v3, %s970_s8  ;;  %820 = vmatmul.mubr.msk.bf16.vlgmr.msra.gmra.mxu0 %vm239_vm2, %v893_v3 }
  0x35   : > { %330 = vrot.lane.b32.xlu1 %v895_v5, %s970_s8  ;;  %838 = vmatpush3.bf16.msra.mxu0 %v257_v8 }
  0x36   : > { %823 = vmatprep.mubr.msk.bf16.mxu0 %vm239_vm2, %v894_v4 }
  0x38   : > { %417 = vrot.lane.b32.xlu0 %v892_v0, %s971_s9 }
  0x39   : > { %502 = vrot.lane.b32.xlu1 %v892_v0, %s972_s10 }
  0x3c   : > { %419 = vrot.lane.b32.xlu0 %v893_v3, %s971_s9  ;;  %824 = vmatmul.mubr.msk.bf16.gmra.mxu0 %vm239_vm2, %v895_v5 }
  0x3d   : > { %504 = vrot.lane.b32.xlu1 %v893_v3, %s972_s10 }
  0x40   : > { %421 = vrot.lane.b32.xlu0 %v894_v4, %s971_s9 }
  0x41   : > { %506 = vrot.lane.b32.xlu1 %v894_v4, %s972_s10 }
  0x44   : > { %423 = vrot.lane.b32.xlu0 %v895_v5, %s971_s9 }
  0x45   : > { %508 = vrot.lane.b32.xlu1 %v895_v5, %s972_s10 }
  0xa2   : > { %v325_v9 = vpop.permute.xlu0 %324 }
  0xa3   : > { %829 = vmatprep.mubr.msk.bf16.mxu1 %vm239_vm2, %v325_v9  ;;  %v329_v10 = vpop.permute.xlu1 %328 }
  0xa6   : > { %v327_v11 = vpop.permute.xlu0 %326 }
  0xa7   : > { %830 = vmatmul.mubr.msk.bf16.vlgmr.msra.gmra.mxu1 %vm239_vm2, %v327_v11  ;;  %v331_v12 = vpop.permute.xlu1 %330 }
  0xa8   : > { %848 = vmatpush3.bf16.msra.mxu1 %v257_v8  ;;  %833 = vmatprep.mubr.msk.bf16.mxu1 %vm239_vm2, %v329_v10 }
  0xaa   : > { %v418_v13 = vpop.permute.xlu0 %417 }
  0xab   : > { %839 = vmatprep.mubr.msk.bf16.mxu0 %vm239_vm2, %v418_v13  ;;  %v503_v14 = vpop.permute.xlu1 %502 }
  0xae   : > { %v420_v15 = vpop.permute.xlu0 %419 }
  0xaf   : > { %834 = vmatmul.mubr.msk.bf16.gmra.mxu1 %vm239_vm2, %v331_v12  ;;  %840 = vmatmul.mubr.msk.bf16.vlgmr.msra.gmra.mxu0 %vm239_vm2, %v420_v15  ;;  %v505_v16 = vpop.permute.xlu1 %504 }
  0xb0   : > { %849 = vmatprep.mubr.msk.bf16.mxu1 %vm239_vm2, %v503_v14 }
  0xb2   : > { %v422_v17 = vpop.permute.xlu0 %421 }
  0xb3   : > { %843 = vmatprep.mubr.msk.bf16.mxu0 %vm239_vm2, %v422_v17  ;;  %v507_v18 = vpop.permute.xlu1 %506 }
  0xb6   : > { %v424_v19 = vpop.permute.xlu0 %423 }
  0xb7   : > { %850 = vmatmul.mubr.msk.bf16.vlgmr.msra.gmra.mxu1 %vm239_vm2, %v505_v16  ;;  %844 = vmatmul.mubr.msk.bf16.gmra.mxu0 %vm239_vm2, %v424_v19  ;;  %v509_v20 = vpop.permute.xlu1 %508 }
  0xb8   : > { %853 = vmatprep.mubr.msk.bf16.mxu1 %vm239_vm2, %v507_v18 }
  0xbf   : > { %854 = vmatmul.mubr.msk.bf16.gmra.mxu1 %vm239_vm2, %v509_v20 }
  0xf4   : > { %v821_v21 = vpop.f32.mrf.mxu0 }
  0xf6   : > { %v293_v22 = vpop.f32.mrf.mxu0 }
  0xf8   : > { %v822_v23 = vpop.f32.mrf.mxu0 }
  0xfa   : > { %v296_v24 = vpop.f32.mrf.mxu0 }
  0xfc   : > { %v825_v25 = vpop.f32.mrf.mxu0 }
  0xfe   : > { %v309_v26 = vpop.f32.mrf.mxu0 }
 0x100   : > { %v1073_v28 = vpop.f32.mrf.mxu0 }
 0x102   : > { %v1075_v31 = vpop.f32.mrf.mxu0 }
 0x167   : > { %v831_v27 = vpop.f32.mrf.mxu1 }
 0x168   : > { %v411_v42 = vmax.f32 %v821_v21, %v831_v27 }
 0x169   : > { %v378_v29 = vpop.f32.mrf.mxu1 }
 0x16a   : > { %v409_v47 = vmax.f32 %v293_v22, %v378_v29 }
 0x16b   : > { %v832_v30 = vpop.f32.mrf.mxu1 }
 0x16c   : > { %v412_v51 = vmax.f32 %v822_v23, %v832_v30 }
 0x16d   : > { %v381_v32 = vpop.f32.mrf.mxu1 }
 0x16e   : > { %v410_v55 = vmax.f32 %v296_v24, %v381_v32 }
 0x16f   : > { %v835_v33 = vpop.f32.mrf.mxu1  ;;  %v841_v34 = vpop.f32.mrf.mxu0 }
 0x170   : > { %v415_v3 = vmax.f32 %v825_v25, %v835_v33 }
 0x171   : > { %v394_v35 = vpop.f32.mrf.mxu1  ;;  %v471_v36 = vpop.f32.mrf.mxu0 }
 0x172   : > { %v413_v4 = vmax.f32 %v309_v26, %v394_v35 }
 0x173   : > { %v836_v37 = vpop.f32.mrf.mxu1  ;;  %v842_v38 = vpop.f32.mrf.mxu0 }
 0x174   : > { %v416_v12 = vmax.f32 %v1073_v28, %v836_v37 }
 0x175   : > { %v397_v39 = vpop.f32.mrf.mxu1  ;;  %v474_v40 = vpop.f32.mrf.mxu0 }
 0x176   : > { %v414_v19 = vmax.f32 %v1075_v31, %v397_v39 }
 0x177   : > { %v851_v41 = vpop.f32.mrf.mxu1  ;;  %v845_v45 = vpop.f32.mrf.mxu0 }
 0x178   : > { %v589_v43 = vmax.f32 %v841_v34, %v851_v41 }
 0x179   : > { %v556_v46 = vpop.f32.mrf.mxu1  ;;  %v487_v56 = vpop.f32.mrf.mxu0 }
 0x17a   : > { %v597_v48 = vmax.f32 %v411_v42, %v589_v43  ;;  %v587_v49 = vmax.f32 %v471_v36, %v556_v46 }
 0x17b   : > { %v852_v50 = vpop.f32.mrf.mxu1  ;;  %v846_v5 = vpop.f32.mrf.mxu0 }
 0x17c   : > { %v611_v52 = vadd.f32 %v778_v44, %v597_v48  ;;  %v595_v53 = vmax.f32 %v409_v47, %v587_v49  ;;  %v590_v54 = vmax.f32 %v842_v38, %v852_v50 }
 0x17d   : > { %v559_v57 = vpop.f32.mrf.mxu1  ;;  %v490_v20 = vpop.f32.mrf.mxu0 }
 0x17e   : > { %v619_v58 = vmax.f32 %v611_v52, 0.0  ;;  %v609_v59 = vadd.f32 %v778_v44, %v595_v53  ;;  %v598_v60 = vmax.f32 %v412_v51, %v590_v54  ;;  %v588_v61 = vmax.f32 %v474_v40, %v559_v57 }
 0x17f   : > { %v855_v62 = vpop.f32.mrf.mxu1 }
 0x180   : > { %v791_v63 = vpack.c.bf16 %v619_v58, %v619_v58  ;;  %v617_v0 = vmax.f32 %v609_v59, 0.0  ;;  %v612_v1 = vadd.f32 %v778_v44, %v598_v60  ;;  %v596_v2 = vmax.f32 %v410_v55, %v588_v61 }
 0x181   : > { %v593_v6 = vmax.f32 %v845_v45, %v855_v62  ;;  %v572_v7 = vpop.f32.mrf.mxu1 }
 0x182   : > { %660 = vst.msk [vmem:[%s1082_s14 + $0x8] sm:$0xf] %vm657_vm3, %v791_v63  ;;  %v789_v8 = vpack.c.bf16 %v617_v0, %v617_v0  ;;  %v620_v9 = vmax.f32 %v612_v1, 0.0  ;;  %v610_v10 = vadd.f32 %v778_v44, %v596_v2  ;;  %v591_v11 = vmax.f32 %v487_v56, %v572_v7 }
 0x183   : > { %v601_v13 = vmax.f32 %v415_v3, %v593_v6  ;;  %v856_v14 = vpop.f32.mrf.mxu1 }
 0x184   : > { %658 = vst.msk [vmem:[%s1082_s14] sm:$0xf] %vm657_vm3, %v789_v8  ;;  %v792_v15 = vpack.c.bf16 %v620_v9, %v620_v9  ;;  %v618_v16 = vmax.f32 %v610_v10, 0.0  ;;  %v599_v17 = vmax.f32 %v413_v4, %v591_v11  ;;  %v594_v18 = vmax.f32 %v846_v5, %v856_v14 }
 0x185   : > { %v615_v21 = vadd.f32 %v778_v44, %v601_v13  ;;  %v575_v22 = vpop.f32.mrf.mxu1 }
 0x186   : > { %661 = vst.msk [vmem:[%s1082_s14 + $0xc] sm:$0xf] %vm657_vm3, %v792_v15  ;;  %v790_v23 = vpack.c.bf16 %v618_v16, %v618_v16  ;;  %v613_v24 = vadd.f32 %v778_v44, %v599_v17  ;;  %v602_v25 = vmax.f32 %v416_v12, %v594_v18  ;;  %v592_v26 = vmax.f32 %v490_v20, %v575_v22 }
 0x187   : > { %v623_v27 = vmax.f32 %v615_v21, 0.0 }
 0x188   : > { %659 = vst.msk [vmem:[%s1082_s14 + $0x4] sm:$0xf] %vm657_vm3, %v790_v23  ;;  %v621_v28 = vmax.f32 %v613_v24, 0.0  ;;  %v616_v29 = vadd.f32 %v778_v44, %v602_v25  ;;  %v600_v30 = vmax.f32 %v414_v19, %v592_v26 }
 0x189   : > { %v795_v31 = vpack.c.bf16 %v623_v27, %v623_v27 }
 0x18a   : > { %v793_v32 = vpack.c.bf16 %v621_v28, %v621_v28  ;;  %v624_v33 = vmax.f32 %v616_v29, 0.0  ;;  %v614_v34 = vadd.f32 %v778_v44, %v600_v30 }
 0x18b   : > { %664 = vst.msk [vmem:[%s1082_s14 + $0x18] sm:$0xf] %vm657_vm3, %v795_v31 }
 0x18c   : > { %662 = vst.msk [vmem:[%s1082_s14 + $0x10] sm:$0xf] %vm657_vm3, %v793_v32  ;;  %v796_v35 = vpack.c.bf16 %v624_v33, %v624_v33  ;;  %v622_v36 = vmax.f32 %v614_v34, 0.0 }
 0x18e   : > { %665 = vst.msk [vmem:[%s1082_s14 + $0x1c] sm:$0xf] %vm657_vm3, %v796_v35  ;;  %v794_v37 = vpack.c.bf16 %v622_v36, %v622_v36 }
 0x190   : > { %663 = vst.msk [vmem:[%s1082_s14 + $0x14] sm:$0xf] %vm657_vm3, %v794_v37 }
 0x191 PF: > { %s15_s12 = sadd.s32 1, %s963_s12  }
 0x192   : > { %p12_p2 = scmp.ge.s32.totalorder %s15_s12, 4  }
 0x194   :  { %14 = sbr.rel (!%p12_p2) target bundleno = 2 (0x2), region = 71 }
 0x199   :  { %688 = vsyncpa [#allocation3], 1 }
 0x19a   :  { %690 = vsyncpa [#allocation3 + $0x1], 1 }
 0x19b   :  { %691 = vsyncpa [#allocation5], 1 }

// kernel: fedavg_cnn_student_forward.3
= control target key start
LH: loop header
LB: loop body
LE: loop exit
PB: predicated region body
PF: predicated region fallthrough
CT: control target
= control target key end

     0   :  { %10 = vsyncpa [#allocation3], 0  ;;  %s6029_s0 = inlined_call_operand.vmem [shape: bf16[2,2048], index: 0, kind: input, shape index: {}]   ;;  %s6030_s1 = inlined_call_operand.hbm [shape: bf16[2048,512], index: 1, kind: input, shape index: {}]   ;;  %s6031_s2 = inlined_call_operand.hbm [shape: f32[1,512], index: 2, kind: input, shape index: {}]   ;;  %s6032_s3 = inlined_call_operand.hbm [shape: bf16[512,128], index: 3, kind: input, shape index: {}]   ;;  %s6033_s4 = inlined_call_operand.hbm [shape: f32[1,128], index: 4, kind: input, shape index: {}]   ;;  %s6034_s5 = inlined_call_operand.hbm [shape: f32[2,128], index: 5, kind: output, shape index: {}]  }
   0x1   :  { %11 = vsyncpa [#allocation6], 0 }
   0x2   :  { %12 = vsyncpa [#allocation9], 0 }
   0x3   :  { %13 = vsyncpa [#allocation4], 0  ;;  %s5820_s18 = smov [#allocation5]   ;;  %s5821_s20 = smov [#allocation2]  }
   0x4   :  { %s34_s19 = sshll.u32 %s5820_s18, 4  ;;  %s21_s21 = sshll.u32 %s5821_s20, 4  ;;  %s35_s19 = int_to_ptr.vmem [resolvable:$true] %s34_s19  ;;  %s22_s21 = int_to_ptr.vmem [resolvable:$true] %s21_s21 }
   0x5   :  { %s5720_s22 = scalar_lea.vmem %s35_s19, 64  ;;  %p5725_p1 = scmp.lt.s32.totalorder %s35_s19, %s35_s19 }
   0x6   :  { %p5721_p0 = scmp.ne.s32.totalorder %s35_s19, %s5720_s22  ;;  %p5726_p2 = scmp.lt.s32.totalorder %s5720_s22, %s5720_s22 }
   0x8   :  { %p5727_p3 = por %p5726_p2, %p5725_p1 }
   0xa   :  { %p5728_p4 = pnand %p5727_p3, %p5721_p0 }
   0xc   :  { %5731 = shalt.err (!%p5728_p4)
}
   0xd   :  { %37 = dma.hbm_to_vmem [thread:$0]  %s6031_s2, 64, %s35_s19, [#allocation6]  }
   0xe   :  { %s5740_s25 = scalar_lea.vmem %s22_s21, 65536  ;;  %p5745_p6 = scmp.lt.s32.totalorder %s22_s21, %s22_s21 }
   0xf   :  { %p5741_p5 = scmp.ne.s32.totalorder %s22_s21, %s5740_s25  ;;  %p5746_p7 = scmp.lt.s32.totalorder %s5740_s25, %s5740_s25 }
  0x11   :  { %p5747_p8 = por %p5746_p7, %p5745_p6 }
  0x13   :  { %p5748_p9 = pnand %p5747_p8, %p5741_p5 }
  0x15   :  { %5751 = shalt.err (!%p5748_p9)
}
  0x16   :  { %s5822_s26 = smov 256   ;;  %s5823_s27 = smov 16  }
  0x17   :  { %27 = dma.hbm_to_vmem [thread:$0]  %s6030_s1, 65536, %s22_s21, [#allocation3], %s5822_s26, %s5822_s26, %s5823_s27  }
  0x18   :  { %s5824_s30 = smov [#allocation7]  }
  0x19   :  { %s43_s6 = sshll.u32 %s5824_s30, 4  ;;  %s44_s6 = int_to_ptr.vmem [resolvable:$true] %s43_s6 }
  0x1a   :  { %s5760_s7 = scalar_lea.vmem %s44_s6, 4096  ;;  %p5765_p11 = scmp.lt.s32.totalorder %s44_s6, %s44_s6 }
  0x1b   :  { %p5761_p10 = scmp.ne.s32.totalorder %s44_s6, %s5760_s7  ;;  %p5766_p12 = scmp.lt.s32.totalorder %s5760_s7, %s5760_s7 }
  0x1d   :  { %p5767_p13 = por %p5766_p12, %p5765_p11 }
  0x1f   :  { %p5768_p0 = pnand %p5767_p13, %p5761_p10 }
  0x21   :  { %5771 = shalt.err (!%p5768_p0)
}
  0x22   :  { %s5825_s2 = smov 64   ;;  %s5826_s8 = smov 4  }
  0x23   :  { %49 = dma.hbm_to_vmem [thread:$0]  %s6032_s3, 4096, %s44_s6, [#allocation6], %s5825_s2, %s5825_s2, %s5826_s8  }
  0x24   :  { %s5827_s11 = smov [#allocation8]  }
  0x25   :  { %s56_s12 = sshll.u32 %s5827_s11, 4  ;;  %s57_s12 = int_to_ptr.vmem [resolvable:$true] %s56_s12 }
  0x26   :  { %s5780_s1 = scalar_lea.vmem %s57_s12, 16  ;;  %s5784_s13 = scalar_lea.vmem %s57_s12, 32 }
  0x27   :  { %p5781_p1 = scmp.ne.s32.totalorder %s57_s12, %s5780_s1  ;;  %p5785_p2 = scmp.lt.s32.totalorder %s57_s12, %s57_s12 }
  0x28   :  { %p5786_p3 = scmp.lt.s32.totalorder %s5784_s13, %s5780_s1 }
  0x2a   :  { %p5787_p4 = por %p5786_p3, %p5785_p2 }
  0x2c   :  { %p5788_p5 = pnand %p5787_p4, %p5781_p1 }
  0x2e   :  { %5791 = shalt.err (!%p5788_p5)
}
  0x2f   :  { %59 = dma.hbm_to_vmem [thread:$0]  %s6033_s4, 16, %s57_s12, [#allocation9]  }
  0x30   :  { %5812 = dma.done.wait [#allocation3], 65536  }
  0x31   :  { %5813 = vsyncadd [#allocation3], 4294901760 }
  0x32   :  { %5814 = dma.done.wait [#allocation6], 4160  }
  0x33   :  { %5815 = vsyncadd [#allocation6], 4294963136 }
  0x34   :  { %5816 = dma.done.wait [#allocation9], 16  }
  0x35   :  { %5817 = vsyncadd [#allocation9], 4294967280  ;;  %v4909_v0 = vld [vmem:[#allocation2 + $0xe4] ss:$16 sps:$4 sm:$0xff]   ;;  %v4913_v2 = vld [vmem:[#allocation2 + $0xe0] ss:$16 sps:$4 sm:$0xff]   ;;  %v589_v36 = vlaneseq }
  0x36   :  { %v4911_v1 = vld [vmem:[#allocation2 + $0x2e4] ss:$16 sps:$4 sm:$0xff]   ;;  %3285 = vmatprep.subr.bf16.mxu0 %v4909_v0  ;;  %v4914_v3 = vld [vmem:[#allocation2 + $0x2e0] ss:$16 sps:$4 sm:$0xff]   ;;  %v5828_v37 = vmov 1966171168  }
  0x37   :  { %3326 = vmatprep.subr.bf16.mxu1 %v4911_v1  ;;  %v4915_v4 = vld [vmem:[#allocation2 + $0xc4] ss:$16 sps:$4 sm:$0xff]   ;;  %3286 = vmatpush1.bf16.msra.mxu0 %v4913_v2  ;;  %v4919_v6 = vld [vmem:[#allocation2 + $0xc0] ss:$16 sps:$4 sm:$0xff]   ;;  %v613_v38 = vunpack.c.l.s4 %v5828_v37  ;;  %v5872_v42 = vshrl.u32 %v589_v36, 7 }
  0x38   :  { %3327 = vmatpush1.bf16.msra.mxu1 %v4914_v3  ;;  %v4917_v5 = vld [vmem:[#allocation2 + $0x2c4] ss:$16 sps:$4 sm:$0xff]   ;;  %3287 = vmatprep.subr.bf16.mxu0 %v4915_v4  ;;  %v4920_v7 = vld [vmem:[#allocation2 + $0x2c0] ss:$16 sps:$4 sm:$0xff]  }
  0x39   :  { %3328 = vmatprep.subr.bf16.mxu1 %v4917_v5  ;;  %v4921_v8 = vld [vmem:[#allocation2 + $0xa4] ss:$16 sps:$4 sm:$0xff]   ;;  %v4925_v10 = vld [vmem:[#allocation2 + $0xa0] ss:$16 sps:$4 sm:$0xff]   ;;  %v614_v43 = vunpack.c.0.s8 %v613_v38 }
  0x3a   :  { %v4923_v9 = vld [vmem:[#allocation2 + $0x2a4] ss:$16 sps:$4 sm:$0xff]   ;;  %v4926_v11 = vld [vmem:[#allocation2 + $0x2a0] ss:$16 sps:$4 sm:$0xff]  }
  0x3b   :  { %3288 = vmatpush1.bf16.msra.mxu0 %v4919_v6  ;;  %v4927_v12 = vld [vmem:[#allocation2 + $0x84] ss:$16 sps:$4 sm:$0xff]   ;;  %v4931_v14 = vld [vmem:[#allocation2 + $0x80] ss:$16 sps:$4 sm:$0xff]   ;;  %v5875_v49 = vsub.s32 %v614_v43, %v5872_v42 }
  0x3c   :  { %3329 = vmatpush1.bf16.msra.mxu1 %v4920_v7  ;;  %3289 = vmatprep.subr.bf16.mxu0 %v4921_v8  ;;  %v4929_v13 = vld [vmem:[#allocation2 + $0x284] ss:$16 sps:$4 sm:$0xff]   ;;  %v4932_v15 = vld [vmem:[#allocation2 + $0x280] ss:$16 sps:$4 sm:$0xff]  }
  0x3d   :  { %3330 = vmatprep.subr.bf16.mxu1 %v4923_v9  ;;  %v4933_v16 = vld [vmem:[#allocation2 + $0x64] ss:$16 sps:$4 sm:$0xff]   ;;  %v4937_v18 = vld [vmem:[#allocation2 + $0x60] ss:$16 sps:$4 sm:$0xff]  }
  0x3e   :  { %v4935_v17 = vld [vmem:[#allocation2 + $0x264] ss:$16 sps:$4 sm:$0xff]   ;;  %v4938_v19 = vld [vmem:[#allocation2 + $0x260] ss:$16 sps:$4 sm:$0xff]  }
  0x3f   :  { %3290 = vmatpush1.bf16.msra.mxu0 %v4925_v10  ;;  %v4939_v20 = vld [vmem:[#allocation2 + $0x44] ss:$16 sps:$4 sm:$0xff]   ;;  %v4943_v22 = vld [vmem:[#allocation2 + $0x40] ss:$16 sps:$4 sm:$0xff]  }
  0x40   :  { %3331 = vmatpush1.bf16.msra.mxu1 %v4926_v11  ;;  %3291 = vmatprep.subr.bf16.mxu0 %v4927_v12  ;;  %v4941_v21 = vld [vmem:[#allocation2 + $0x244] ss:$16 sps:$4 sm:$0xff]   ;;  %v4944_v23 = vld [vmem:[#allocation2 + $0x240] ss:$16 sps:$4 sm:$0xff]  }
  0x41   :  { %3332 = vmatprep.subr.bf16.mxu1 %v4929_v13  ;;  %v4945_v24 = vld [vmem:[#allocation2 + $0x24] ss:$16 sps:$4 sm:$0xff]   ;;  %v4949_v26 = vld [vmem:[#allocation2 + $0x20] ss:$16 sps:$4 sm:$0xff]  }
  0x42   :  { %v4947_v25 = vld [vmem:[#allocation2 + $0x224] ss:$16 sps:$4 sm:$0xff]   ;;  %v4950_v27 = vld [vmem:[#allocation2 + $0x220] ss:$16 sps:$4 sm:$0xff]  }
  0x43   :  { %3292 = vmatpush1.bf16.msra.mxu0 %v4931_v14  ;;  %v4951_v28 = vld [vmem:[#allocation2 + $0x4] ss:$16 sps:$4 sm:$0xff]   ;;  %v4955_v30 = vld [vmem:[#allocation2] ss:$16 sps:$4 sm:$0xff]  }
  0x44   :  { %3333 = vmatpush1.bf16.msra.mxu1 %v4932_v15  ;;  %3293 = vmatprep.subr.bf16.mxu0 %v4933_v16  ;;  %v4953_v29 = vld [vmem:[#allocation2 + $0x204] ss:$16 sps:$4 sm:$0xff]   ;;  %v4956_v31 = vld [vmem:[#allocation2 + $0x200] ss:$16 sps:$4 sm:$0xff]  }
  0x45   :  { %3334 = vmatprep.subr.bf16.mxu1 %v4935_v17  ;;  %v4957_v32 = vld [vmem:[#allocation2 + $0x1e4] ss:$16 sps:$4 sm:$0xff]   ;;  %v4961_v34 = vld [vmem:[#allocation2 + $0x1e0] ss:$16 sps:$4 sm:$0xff]  }
  0x46   :  { %v4959_v33 = vld [vmem:[#allocation2 + $0x3e4] ss:$16 sps:$4 sm:$0xff]   ;;  %v4962_v35 = vld [vmem:[#allocation2 + $0x3e0] ss:$16 sps:$4 sm:$0xff]  }
  0x47   :  { %3294 = vmatpush1.bf16.msra.mxu0 %v4937_v18  ;;  %v4963_v39 = vld [vmem:[#allocation2 + $0x1c4] ss:$16 sps:$4 sm:$0xff]   ;;  %v4967_v41 = vld [vmem:[#allocation2 + $0x1c0] ss:$16 sps:$4 sm:$0xff]  }
  0x48   :  { %3335 = vmatpush1.bf16.msra.mxu1 %v4938_v19  ;;  %3295 = vmatprep.subr.bf16.mxu0 %v4939_v20  ;;  %v4965_v40 = vld [vmem:[#allocation2 + $0x3c4] ss:$16 sps:$4 sm:$0xff]   ;;  %v4968_v44 = vld [vmem:[#allocation2 + $0x3c0] ss:$16 sps:$4 sm:$0xff]  }
  0x49   :  { %3336 = vmatprep.subr.bf16.mxu1 %v4941_v21  ;;  %v4969_v45 = vld [vmem:[#allocation2 + $0x1a4] ss:$16 sps:$4 sm:$0xff]   ;;  %v4973_v47 = vld [vmem:[#allocation2 + $0x1a0] ss:$16 sps:$4 sm:$0xff]  }
  0x4a   :  { %v4971_v46 = vld [vmem:[#allocation2 + $0x3a4] ss:$16 sps:$4 sm:$0xff]   ;;  %v4974_v48 = vld [vmem:[#allocation2 + $0x3a0] ss:$16 sps:$4 sm:$0xff]  }
  0x4b   :  { %3296 = vmatpush1.bf16.msra.mxu0 %v4943_v22  ;;  %v4975_v50 = vld [vmem:[#allocation2 + $0x184] ss:$16 sps:$4 sm:$0xff]   ;;  %v4979_v53 = vld [vmem:[#allocation2 + $0x180] ss:$16 sps:$4 sm:$0xff]  }
  0x4c   :  { %3337 = vmatpush1.bf16.msra.mxu1 %v4944_v23  ;;  %3297 = vmatprep.subr.bf16.mxu0 %v4945_v24  ;;  %v4977_v51 = vld [vmem:[#allocation2 + $0x384] ss:$16 sps:$4 sm:$0xff]   ;;  %v4980_v55 = vld [vmem:[#allocation2 + $0x380] ss:$16 sps:$4 sm:$0xff]  }
  0x4d   :  { %3338 = vmatprep.subr.bf16.mxu1 %v4947_v25  ;;  %v73_v52 = vld [vmem:[%s6029_s0] sm:$0xff] }
  0x4e   :  { %v618_v54 = vrot.slane %v73_v52, %v5875_v49  ;;  %v4981_v56 = vld [vmem:[#allocation2 + $0x164] ss:$16 sps:$4 sm:$0xff]   ;;  %v4985_v59 = vld [vmem:[#allocation2 + $0x160] ss:$16 sps:$4 sm:$0xff]   ;;  %v611_v1 = vcombine.high %v73_v52, %v73_v52 }
  0x4f   :  { %3298 = vmatpush1.bf16.msra.mxu0 %v4949_v26  ;;  %v4983_v57 = vld [vmem:[#allocation2 + $0x364] ss:$16 sps:$4 sm:$0xff]   ;;  %v4986_v61 = vld [vmem:[#allocation2 + $0x360] ss:$16 sps:$4 sm:$0xff]  }
  0x50   :  { %3339 = vmatpush1.bf16.msra.mxu1 %v4950_v27  ;;  %3299 = vmatprep.subr.bf16.mxu0 %v4951_v28  ;;  %v626_v58 = vcombine.high %v618_v54, %v618_v54  ;;  %v4987_v62 = vld [vmem:[#allocation2 + $0x144] ss:$16 sps:$4 sm:$0xff]   ;;  %v4991_v2 = vld [vmem:[#allocation2 + $0x140] ss:$16 sps:$4 sm:$0xff]   ;;  %v5891_v6 = vrot.slane %v611_v1, %v5875_v49  ;;  %v5896_v13 = vrot.slane %v618_v54, %v5875_v49 }
  0x51   :  { %3340 = vmatprep.subr.bf16.mxu1 %v4953_v29  ;;  %v4989_v63 = vld [vmem:[#allocation2 + $0x344] ss:$16 sps:$4 sm:$0xff]   ;;  %v4992_v3 = vld [vmem:[#allocation2 + $0x340] ss:$16 sps:$4 sm:$0xff]  }
  0x52   :  { %v5882_v60 = vrot.slane %v626_v58, %v5875_v49  ;;  %v4993_v4 = vld [vmem:[#allocation2 + $0x124] ss:$16 sps:$4 sm:$0xff]   ;;  %v4997_v7 = vld [vmem:[#allocation2 + $0x120] ss:$16 sps:$4 sm:$0xff]   ;;  %v627_v11 = vcombine.high %v5891_v6, %v5891_v6  ;;  %v5903_v18 = vcombine.high %v5896_v13, %v5896_v13 }
  0x53   :  { %3300 = vmatpush1.bf16.msra.mxu0 %v4955_v30  ;;  %v4995_v5 = vld [vmem:[#allocation2 + $0x324] ss:$16 sps:$4 sm:$0xff]   ;;  %v4998_v8 = vld [vmem:[#allocation2 + $0x320] ss:$16 sps:$4 sm:$0xff]  }
  0x54   :  { %3341 = vmatpush1.bf16.msra.mxu1 %v4956_v31  ;;  %3301 = vmatprep.subr.bf16.mxu0 %v4957_v32  ;;  %v5886_v0 = vcombine.high %v5882_v60, %v5882_v60  ;;  %v4999_v9 = vld [vmem:[#allocation2 + $0x104] ss:$16 sps:$4 sm:$0xff]   ;;  %v5003_v12 = vld [vmem:[#allocation2 + $0x100] ss:$16 sps:$4 sm:$0xff]   ;;  %v5899_v17 = vrot.slane %v627_v11, %v5875_v49 }
  0x55   :  { %3342 = vmatprep.subr.bf16.mxu1 %v4959_v33  ;;  %3317 = vmatprep.mubr.bf16.mxu0 %v5882_v60  ;;  %v5001_v10 = vld [vmem:[#allocation2 + $0x304] ss:$16 sps:$4 sm:$0xff]   ;;  %v5004_v14 = vld [vmem:[#allocation2 + $0x300] ss:$16 sps:$4 sm:$0xff]  }
  0x56   :  { %3358 = vmatprep.mubr.bf16.mxu1 %v5886_v0  ;;  %v5007_v15 = vld [vmem:[#allocation2 + $0x4e4] ss:$16 sps:$4 sm:$0xff]   ;;  %v5005_v19 = vld [vmem:[#allocation2 + $0x4e0] ss:$16 sps:$4 sm:$0xff]   ;;  %v5907_v23 = vcombine.high %v5899_v17, %v5899_v17 }
  0x57   :  { %3302 = vmatpush2.bf16.msra.mxu0 %v4961_v34  ;;  %v5010_v16 = vld [vmem:[#allocation2 + $0x6e4] ss:$16 sps:$4 sm:$0xff]   ;;  %v5008_v20 = vld [vmem:[#allocation2 + $0x6e0] ss:$16 sps:$4 sm:$0xff]  }
  0x58   :  { %3343 = vmatpush2.bf16.msra.mxu1 %v4962_v35  ;;  %3303 = vmatprep.subr.bf16.mxu0 %v4963_v39  ;;  %v5013_v21 = vld [vmem:[#allocation2 + $0x4c4] ss:$16 sps:$4 sm:$0xff]   ;;  %v5011_v24 = vld [vmem:[#allocation2 + $0x4c0] ss:$16 sps:$4 sm:$0xff]  }
  0x59   :  { %3344 = vmatprep.subr.bf16.mxu1 %v4965_v40  ;;  %v5016_v22 = vld [vmem:[#allocation2 + $0x6c4] ss:$16 sps:$4 sm:$0xff]   ;;  %v5014_v25 = vld [vmem:[#allocation2 + $0x6c0] ss:$16 sps:$4 sm:$0xff]  }
  0x5a   :  { %v5019_v26 = vld [vmem:[#allocation2 + $0x4a4] ss:$16 sps:$4 sm:$0xff]   ;;  %v5017_v28 = vld [vmem:[#allocation2 + $0x4a0] ss:$16 sps:$4 sm:$0xff]  }
  0x5b   :  { %3304 = vmatpush2.bf16.msra.mxu0 %v4967_v41  ;;  %v5022_v27 = vld [vmem:[#allocation2 + $0x6a4] ss:$16 sps:$4 sm:$0xff]   ;;  %v5020_v29 = vld [vmem:[#allocation2 + $0x6a0] ss:$16 sps:$4 sm:$0xff]  }
  0x5c   :  { %3345 = vmatpush2.bf16.msra.mxu1 %v4968_v44  ;;  %3305 = vmatprep.subr.bf16.mxu0 %v4969_v45  ;;  %v5025_v30 = vld [vmem:[#allocation2 + $0x484] ss:$16 sps:$4 sm:$0xff]   ;;  %v5023_v32 = vld [vmem:[#allocation2 + $0x480] ss:$16 sps:$4 sm:$0xff]  }
  0x5d   :  { %3346 = vmatprep.subr.bf16.mxu1 %v4971_v46  ;;  %v5028_v31 = vld [vmem:[#allocation2 + $0x684] ss:$16 sps:$4 sm:$0xff]   ;;  %v5026_v33 = vld [vmem:[#allocation2 + $0x680] ss:$16 sps:$4 sm:$0xff]  }
  0x5e   :  { %v5031_v34 = vld [vmem:[#allocation2 + $0x464] ss:$16 sps:$4 sm:$0xff]   ;;  %v5029_v36 = vld [vmem:[#allocation2 + $0x460] ss:$16 sps:$4 sm:$0xff]  }
  0x5f   :  { %3306 = vmatpush2.bf16.msra.mxu0 %v4973_v47  ;;  %v5034_v35 = vld [vmem:[#allocation2 + $0x664] ss:$16 sps:$4 sm:$0xff]   ;;  %v5032_v37 = vld [vmem:[#allocation2 + $0x660] ss:$16 sps:$4 sm:$0xff]  }
  0x60   :  { %3347 = vmatpush2.bf16.msra.mxu1 %v4974_v48  ;;  %3307 = vmatprep.subr.bf16.mxu0 %v4975_v50  ;;  %v5037_v38 = vld [vmem:[#allocation2 + $0x444] ss:$16 sps:$4 sm:$0xff]   ;;  %v5035_v40 = vld [vmem:[#allocation2 + $0x440] ss:$16 sps:$4 sm:$0xff]  }
  0x61   :  { %3348 = vmatprep.subr.bf16.mxu1 %v4977_v51  ;;  %v5040_v39 = vld [vmem:[#allocation2 + $0x644] ss:$16 sps:$4 sm:$0xff]   ;;  %v5038_v41 = vld [vmem:[#allocation2 + $0x640] ss:$16 sps:$4 sm:$0xff]  }
  0x62   :  { %v5043_v43 = vld [vmem:[#allocation2 + $0x424] ss:$16 sps:$4 sm:$0xff]   ;;  %v5041_v45 = vld [vmem:[#allocation2 + $0x420] ss:$16 sps:$4 sm:$0xff]  }
  0x63   :  { %3308 = vmatpush2.bf16.msra.mxu0 %v4979_v53  ;;  %v5046_v44 = vld [vmem:[#allocation2 + $0x624] ss:$16 sps:$4 sm:$0xff]   ;;  %v5044_v46 = vld [vmem:[#allocation2 + $0x620] ss:$16 sps:$4 sm:$0xff]  }
  0x64   :  { %3349 = vmatpush2.bf16.msra.mxu1 %v4980_v55  ;;  %3309 = vmatprep.subr.bf16.mxu0 %v4981_v56  ;;  %v5049_v47 = vld [vmem:[#allocation2 + $0x404] ss:$16 sps:$4 sm:$0xff]   ;;  %v5047_v50 = vld [vmem:[#allocation2 + $0x400] ss:$16 sps:$4 sm:$0xff]  }
  0x65   :  { %3350 = vmatprep.subr.bf16.mxu1 %v4983_v57  ;;  %v5052_v48 = vld [vmem:[#allocation2 + $0x604] ss:$16 sps:$4 sm:$0xff]   ;;  %v5050_v51 = vld [vmem:[#allocation2 + $0x600] ss:$16 sps:$4 sm:$0xff]  }
  0x66   :  { %v5055_v52 = vld [vmem:[#allocation2 + $0x5e4] ss:$16 sps:$4 sm:$0xff]   ;;  %v5053_v54 = vld [vmem:[#allocation2 + $0x5e0] ss:$16 sps:$4 sm:$0xff]  }
  0x67   :  { %3310 = vmatpush2.bf16.msra.mxu0 %v4985_v59  ;;  %v5058_v53 = vld [vmem:[#allocation2 + $0x7e4] ss:$16 sps:$4 sm:$0xff]   ;;  %v5056_v55 = vld [vmem:[#allocation2 + $0x7e0] ss:$16 sps:$4 sm:$0xff]  }
  0x68   :  { %3351 = vmatpush2.bf16.msra.mxu1 %v4986_v61  ;;  %3311 = vmatprep.subr.bf16.mxu0 %v4987_v62  ;;  %v5061_v56 = vld [vmem:[#allocation2 + $0x5c4] ss:$16 sps:$4 sm:$0xff]   ;;  %v5059_v58 = vld [vmem:[#allocation2 + $0x5c0] ss:$16 sps:$4 sm:$0xff]  }
  0x69   :  { %3352 = vmatprep.subr.bf16.mxu1 %v4989_v63  ;;  %v5064_v57 = vld [vmem:[#allocation2 + $0x7c4] ss:$16 sps:$4 sm:$0xff]   ;;  %v5062_v59 = vld [vmem:[#allocation2 + $0x7c0] ss:$16 sps:$4 sm:$0xff]  }
  0x6a   :  { %v5067_v61 = vld [vmem:[#allocation2 + $0x5a4] ss:$16 sps:$4 sm:$0xff]   ;;  %v5065_v63 = vld [vmem:[#allocation2 + $0x5a0] ss:$16 sps:$4 sm:$0xff]  }
  0x6b   :  { %3312 = vmatpush2.bf16.msra.mxu0 %v4991_v2  ;;  %v5070_v62 = vld [vmem:[#allocation2 + $0x7a4] ss:$16 sps:$4 sm:$0xff]   ;;  %v5068_v1 = vld [vmem:[#allocation2 + $0x7a0] ss:$16 sps:$4 sm:$0xff]  }
  0x6c   :  { %3353 = vmatpush2.bf16.msra.mxu1 %v4992_v3  ;;  %3313 = vmatprep.subr.bf16.mxu0 %v4993_v4  ;;  %v5073_v2 = vld [vmem:[#allocation2 + $0x584] ss:$16 sps:$4 sm:$0xff]   ;;  %v5071_v4 = vld [vmem:[#allocation2 + $0x580] ss:$16 sps:$4 sm:$0xff]  }
  0x6d   :  { %3354 = vmatprep.subr.bf16.mxu1 %v4995_v5  ;;  %v5076_v3 = vld [vmem:[#allocation2 + $0x784] ss:$16 sps:$4 sm:$0xff]   ;;  %v5074_v5 = vld [vmem:[#allocation2 + $0x780] ss:$16 sps:$4 sm:$0xff]  }
  0x6e   :  { %v5085_v11 = vld [vmem:[#allocation2 + $0x544] ss:$16 sps:$4 sm:$0xff]  }
  0x6f   :  { %3314 = vmatpush2.bf16.msra.mxu0 %v4997_v7  ;;  %v5079_v7 = vld [vmem:[#allocation2 + $0x564] ss:$16 sps:$4 sm:$0xff]  }
  0x70   :  { %3355 = vmatpush2.bf16.msra.mxu1 %v4998_v8  ;;  %3315 = vmatprep.subr.bf16.mxu0 %v4999_v9  ;;  %v5082_v8 = vld [vmem:[#allocation2 + $0x764] ss:$16 sps:$4 sm:$0xff]   ;;  %v5077_v9 = vld [vmem:[#allocation2 + $0x560] ss:$16 sps:$4 sm:$0xff]  }
  0x71   :  { %3356 = vmatprep.subr.bf16.mxu1 %v5001_v10  ;;  %v5080_v10 = vld [vmem:[#allocation2 + $0x760] ss:$16 sps:$4 sm:$0xff]  }
  0x73   :  { %3316 = vmatpush2.bf16.msra.mxu0 %v5003_v12  ;;  %v5088_v12 = vld [vmem:[#allocation2 + $0x744] ss:$16 sps:$4 sm:$0xff]  }
  0x74   :  { %3357 = vmatpush2.bf16.msra.mxu1 %v5004_v14  ;;  %3367 = vmatprep.subr.bf16.mxu0 %v5007_v15  ;;  %v5083_v14 = vld [vmem:[#allocation2 + $0x540] ss:$16 sps:$4 sm:$0xff]  }
  0x75   :  { %3408 = vmatprep.subr.bf16.mxu1 %v5010_v16  ;;  %v5086_v15 = vld [vmem:[#allocation2 + $0x740] ss:$16 sps:$4 sm:$0xff]   ;;  %v5091_v16 = vld [vmem:[#allocation2 + $0x524] ss:$16 sps:$4 sm:$0xff]  }
  0x76   :  { %3318 = vmatmul.mubr.bf16.vlgmr.msra.gmra.mxu0 %v5896_v13 }
  0x77   :  { %3359 = vmatmul.mubr.bf16.vlgmr.msra.gmra.mxu1 %v5903_v18  ;;  %3368 = vmatpush1.bf16.msra.mxu0 %v5005_v19  ;;  %v5094_v19 = vld [vmem:[#allocation2 + $0x724] ss:$16 sps:$4 sm:$0xff]  }
  0x78   :  { %3409 = vmatpush1.bf16.msra.mxu1 %v5008_v20  ;;  %3369 = vmatprep.subr.bf16.mxu0 %v5013_v21  ;;  %v5089_v20 = vld [vmem:[#allocation2 + $0x520] ss:$16 sps:$4 sm:$0xff]  }
  0x79   :  { %3410 = vmatprep.subr.bf16.mxu1 %v5016_v22  ;;  %3399 = vmatprep.mubr.bf16.mxu0 %v5899_v17  ;;  %v5092_v21 = vld [vmem:[#allocation2 + $0x720] ss:$16 sps:$4 sm:$0xff]   ;;  %v5097_v22 = vld [vmem:[#allocation2 + $0x504] ss:$16 sps:$4 sm:$0xff]  }
  0x7a   :  { %3440 = vmatprep.mubr.bf16.mxu1 %v5907_v23 }
  0x7b   :  { %3370 = vmatpush1.bf16.msra.mxu0 %v5011_v24  ;;  %v5100_v24 = vld [vmem:[#allocation2 + $0x704] ss:$16 sps:$4 sm:$0xff]  }
  0x7c   :  { %3411 = vmatpush1.bf16.msra.mxu1 %v5014_v25  ;;  %3371 = vmatprep.subr.bf16.mxu0 %v5019_v26  ;;  %v5095_v25 = vld [vmem:[#allocation2 + $0x500] ss:$16 sps:$4 sm:$0xff]   ;;  %v5915_v26 = vrot.slane %v5891_v6, %v5875_v49  ;;  %v5924_v6 = vld [vmem:[%s6029_s0 + $0x8] sm:$0xff]  ;;  %s5829_s0 = smov [#allocation10]  }
  0x7d   :  { %3412 = vmatprep.subr.bf16.mxu1 %v5022_v27  ;;  %v5098_v27 = vld [vmem:[#allocation2 + $0x700] ss:$16 sps:$4 sm:$0xff]   ;;  %s4299_s18 = sshll.u32 %s5829_s0, 4  ;;  %s4300_s18 = int_to_ptr.vmem [resolvable:$true] %s4299_s18 }
  0x7e   :  { %s5792_s19 = scalar_lea.vmem %s4300_s18, 32  ;;  %p5797_p7 = scmp.lt.s32.totalorder %s4300_s18, %s4300_s18 }
  0x7f   :  { %3372 = vmatpush1.bf16.msra.mxu0 %v5017_v28  ;;  %v5104_v28 = vld [vmem:[#allocation2 + $0x8e4] ss:$16 sps:$4 sm:$0xff]   ;;  %p5793_p6 = scmp.ne.s32.totalorder %s4300_s18, %s5792_s19  ;;  %p5798_p8 = scmp.lt.s32.totalorder %s5792_s19, %s5792_s19 }
  0x80   :  { %3413 = vmatpush1.bf16.msra.mxu1 %v5020_v29  ;;  %3373 = vmatprep.subr.bf16.mxu0 %v5025_v30  ;;  %v5107_v29 = vld [vmem:[#allocation2 + $0xae4] ss:$16 sps:$4 sm:$0xff]   ;;  %v5919_v30 = vcombine.high %v5915_v26, %v5915_v26 }
  0x81   :  { %3414 = vmatprep.subr.bf16.mxu1 %v5028_v31  ;;  %v5102_v31 = vld [vmem:[#allocation2 + $0x8e0] ss:$16 sps:$4 sm:$0xff]   ;;  %p5799_p9 = por %p5798_p8, %p5797_p7 }
  0x83   :  { %3374 = vmatpush1.bf16.msra.mxu0 %v5023_v32  ;;  %v5105_v32 = vld [vmem:[#allocation2 + $0xae0] ss:$16 sps:$4 sm:$0xff]   ;;  %p5800_p10 = pnand %p5799_p9, %p5793_p6 }
  0x84   :  { %3415 = vmatpush1.bf16.msra.mxu1 %v5026_v33  ;;  %3375 = vmatprep.subr.bf16.mxu0 %v5031_v34  ;;  %v5110_v33 = vld [vmem:[#allocation2 + $0x8c4] ss:$16 sps:$4 sm:$0xff]  }
  0x85   :  { %3416 = vmatprep.subr.bf16.mxu1 %v5034_v35  ;;  %v5113_v34 = vld [vmem:[#allocation2 + $0xac4] ss:$16 sps:$4 sm:$0xff]   ;;  %v5928_v35 = vrot.slane %v5924_v6, %v5875_v49 }
  0x87   :  { %3376 = vmatpush1.bf16.msra.mxu0 %v5029_v36  ;;  %v675_v36 = vcombine.high %v5928_v35, %v5928_v35 }
  0x88   :  { %3417 = vmatpush1.bf16.msra.mxu1 %v5032_v37  ;;  %3377 = vmatprep.subr.bf16.mxu0 %v5037_v38  ;;  %v5108_v37 = vld [vmem:[#allocation2 + $0x8c0] ss:$16 sps:$4 sm:$0xff]  }
  0x89   :  { %3418 = vmatprep.subr.bf16.mxu1 %v5040_v39  ;;  %v5111_v38 = vld [vmem:[#allocation2 + $0xac0] ss:$16 sps:$4 sm:$0xff]   ;;  %v5116_v39 = vld [vmem:[#allocation2 + $0x8a4] ss:$16 sps:$4 sm:$0xff]  }
  0x8b   :  { %3378 = vmatpush1.bf16.msra.mxu0 %v5035_v40  ;;  %v5119_v40 = vld [vmem:[#allocation2 + $0xaa4] ss:$16 sps:$4 sm:$0xff]  }
  0x8c   :  { %3419 = vmatpush1.bf16.msra.mxu1 %v5038_v41  ;;  %3379 = vmatprep.subr.bf16.mxu0 %v5043_v43  ;;  %v5935_v41 = vrot.slane %v675_v36, %v5875_v49  ;;  %v5180_v36 = vld [vmem:[#allocation2 + $0x940] ss:$16 sps:$4 sm:$0xff]  }
  0x8d   :  { %3420 = vmatprep.subr.bf16.mxu1 %v5046_v44  ;;  %v5114_v44 = vld [vmem:[#allocation2 + $0x8a0] ss:$16 sps:$4 sm:$0xff]  }
  0x8e   :  { %v5940_v43 = vcombine.high %v5935_v41, %v5935_v41 }
  0x8f   :  { %3380 = vmatpush1.bf16.msra.mxu0 %v5041_v45  ;;  %v5117_v45 = vld [vmem:[#allocation2 + $0xaa0] ss:$16 sps:$4 sm:$0xff]  }
  0x90   :  { %3421 = vmatpush1.bf16.msra.mxu1 %v5044_v46  ;;  %3381 = vmatprep.subr.bf16.mxu0 %v5049_v47  ;;  %v5122_v46 = vld [vmem:[#allocation2 + $0x884] ss:$16 sps:$4 sm:$0xff]  }
  0x91   :  { %3422 = vmatprep.subr.bf16.mxu1 %v5052_v48  ;;  %v5125_v47 = vld [vmem:[#allocation2 + $0xa84] ss:$16 sps:$4 sm:$0xff]   ;;  %v5120_v48 = vld [vmem:[#allocation2 + $0x880] ss:$16 sps:$4 sm:$0xff]  }
  0x93   :  { %3382 = vmatpush1.bf16.msra.mxu0 %v5047_v50  ;;  %v5123_v50 = vld [vmem:[#allocation2 + $0xa80] ss:$16 sps:$4 sm:$0xff]  }
  0x94   :  { %3423 = vmatpush1.bf16.msra.mxu1 %v5050_v51  ;;  %3383 = vmatprep.subr.bf16.mxu0 %v5055_v52  ;;  %v5128_v51 = vld [vmem:[#allocation2 + $0x864] ss:$16 sps:$4 sm:$0xff]  }
  0x95   :  { %3424 = vmatprep.subr.bf16.mxu1 %v5058_v53  ;;  %v5131_v52 = vld [vmem:[#allocation2 + $0xa64] ss:$16 sps:$4 sm:$0xff]   ;;  %v5126_v53 = vld [vmem:[#allocation2 + $0x860] ss:$16 sps:$4 sm:$0xff]  }
  0x97   :  { %3384 = vmatpush2.bf16.msra.mxu0 %v5053_v54  ;;  %v5129_v54 = vld [vmem:[#allocation2 + $0xa60] ss:$16 sps:$4 sm:$0xff]  }
  0x98   :  { %3425 = vmatpush2.bf16.msra.mxu1 %v5056_v55  ;;  %3385 = vmatprep.subr.bf16.mxu0 %v5061_v56  ;;  %v5134_v55 = vld [vmem:[#allocation2 + $0x844] ss:$16 sps:$4 sm:$0xff]  }
  0x99   :  { %3426 = vmatprep.subr.bf16.mxu1 %v5064_v57  ;;  %v5137_v56 = vld [vmem:[#allocation2 + $0xa44] ss:$16 sps:$4 sm:$0xff]   ;;  %v5132_v57 = vld [vmem:[#allocation2 + $0x840] ss:$16 sps:$4 sm:$0xff]  }
  0x9b   :  { %3386 = vmatpush2.bf16.msra.mxu0 %v5059_v58  ;;  %v5135_v58 = vld [vmem:[#allocation2 + $0xa40] ss:$16 sps:$4 sm:$0xff]  }
  0x9c   :  { %3427 = vmatpush2.bf16.msra.mxu1 %v5062_v59  ;;  %3387 = vmatprep.subr.bf16.mxu0 %v5067_v61  ;;  %v5140_v59 = vld [vmem:[#allocation2 + $0x824] ss:$16 sps:$4 sm:$0xff]  }
  0x9d   :  { %3428 = vmatprep.subr.bf16.mxu1 %v5070_v62  ;;  %v5143_v61 = vld [vmem:[#allocation2 + $0xa24] ss:$16 sps:$4 sm:$0xff]   ;;  %v5138_v62 = vld [vmem:[#allocation2 + $0x820] ss:$16 sps:$4 sm:$0xff]  }
  0x9f   :  { %3388 = vmatpush2.bf16.msra.mxu0 %v5065_v63  ;;  %v5141_v63 = vld [vmem:[#allocation2 + $0xa20] ss:$16 sps:$4 sm:$0xff]  }
  0xa0   :  { %3429 = vmatpush2.bf16.msra.mxu1 %v5068_v1  ;;  %3389 = vmatprep.subr.bf16.mxu0 %v5073_v2  ;;  %v5146_v1 = vld [vmem:[#allocation2 + $0x804] ss:$16 sps:$4 sm:$0xff]  }
  0xa1   :  { %3430 = vmatprep.subr.bf16.mxu1 %v5076_v3  ;;  %v5149_v2 = vld [vmem:[#allocation2 + $0xa04] ss:$16 sps:$4 sm:$0xff]   ;;  %v5144_v3 = vld [vmem:[#allocation2 + $0x800] ss:$16 sps:$4 sm:$0xff]  }
  0xa3   :  { %3390 = vmatpush2.bf16.msra.mxu0 %v5071_v4  ;;  %v5147_v4 = vld [vmem:[#allocation2 + $0xa00] ss:$16 sps:$4 sm:$0xff]  }
  0xa4   :  { %3431 = vmatpush2.bf16.msra.mxu1 %v5074_v5  ;;  %3391 = vmatprep.subr.bf16.mxu0 %v5079_v7  ;;  %v5152_v5 = vld [vmem:[#allocation2 + $0x9e4] ss:$16 sps:$4 sm:$0xff]  }
  0xa5   :  { %3432 = vmatprep.subr.bf16.mxu1 %v5082_v8  ;;  %v5155_v7 = vld [vmem:[#allocation2 + $0xbe4] ss:$16 sps:$4 sm:$0xff]   ;;  %v5150_v8 = vld [vmem:[#allocation2 + $0x9e0] ss:$16 sps:$4 sm:$0xff]  }
  0xa7   :  { %3392 = vmatpush2.bf16.msra.mxu0 %v5077_v9  ;;  %v5153_v9 = vld [vmem:[#allocation2 + $0xbe0] ss:$16 sps:$4 sm:$0xff]  }
  0xa8   :  { %3433 = vmatpush2.bf16.msra.mxu1 %v5080_v10  ;;  %3393 = vmatprep.subr.bf16.mxu0 %v5085_v11  ;;  %v5158_v10 = vld [vmem:[#allocation2 + $0x9c4] ss:$16 sps:$4 sm:$0xff]  }
  0xa9   :  { %3434 = vmatprep.subr.bf16.mxu1 %v5088_v12  ;;  %v5161_v11 = vld [vmem:[#allocation2 + $0xbc4] ss:$16 sps:$4 sm:$0xff]   ;;  %v5156_v12 = vld [vmem:[#allocation2 + $0x9c0] ss:$16 sps:$4 sm:$0xff]  }
  0xab   :  { %3394 = vmatpush2.bf16.msra.mxu0 %v5083_v14  ;;  %v5159_v14 = vld [vmem:[#allocation2 + $0xbc0] ss:$16 sps:$4 sm:$0xff]  }
  0xac   :  { %3435 = vmatpush2.bf16.msra.mxu1 %v5086_v15  ;;  %3395 = vmatprep.subr.bf16.mxu0 %v5091_v16  ;;  %v5164_v15 = vld [vmem:[#allocation2 + $0x9a4] ss:$16 sps:$4 sm:$0xff]  }
  0xad   :  { %3436 = vmatprep.subr.bf16.mxu1 %v5094_v19  ;;  %v5167_v16 = vld [vmem:[#allocation2 + $0xba4] ss:$16 sps:$4 sm:$0xff]   ;;  %v5162_v19 = vld [vmem:[#allocation2 + $0x9a0] ss:$16 sps:$4 sm:$0xff]  }
  0xaf   :  { %3396 = vmatpush2.bf16.msra.mxu0 %v5089_v20  ;;  %v5165_v20 = vld [vmem:[#allocation2 + $0xba0] ss:$16 sps:$4 sm:$0xff]  }
  0xb0   :  { %3437 = vmatpush2.bf16.msra.mxu1 %v5092_v21  ;;  %3397 = vmatprep.subr.bf16.mxu0 %v5097_v22  ;;  %v5170_v21 = vld [vmem:[#allocation2 + $0x984] ss:$16 sps:$4 sm:$0xff]  }
  0xb1   :  { %3438 = vmatprep.subr.bf16.mxu1 %v5100_v24  ;;  %v5173_v22 = vld [vmem:[#allocation2 + $0xb84] ss:$16 sps:$4 sm:$0xff]   ;;  %v5168_v24 = vld [vmem:[#allocation2 + $0x980] ss:$16 sps:$4 sm:$0xff]  }
  0xb3   :  { %3398 = vmatpush2.bf16.msra.mxu0 %v5095_v25  ;;  %v5171_v25 = vld [vmem:[#allocation2 + $0xb80] ss:$16 sps:$4 sm:$0xff]  }
  0xb4   :  { %3439 = vmatpush2.bf16.msra.mxu1 %v5098_v27  ;;  %3449 = vmatprep.subr.bf16.mxu0 %v5104_v28  ;;  %v5176_v27 = vld [vmem:[#allocation2 + $0x964] ss:$16 sps:$4 sm:$0xff]  }
  0xb5   :  { %3490 = vmatprep.subr.bf16.mxu1 %v5107_v29  ;;  %v5179_v28 = vld [vmem:[#allocation2 + $0xb64] ss:$16 sps:$4 sm:$0xff]   ;;  %v5174_v29 = vld [vmem:[#allocation2 + $0x960] ss:$16 sps:$4 sm:$0xff]  }
  0xb6   :  { %3400 = vmatmul.mubr.bf16.vlgmr.msra.gmra.mxu0 %v5915_v26 }
  0xb7   :  { %3441 = vmatmul.mubr.bf16.vlgmr.msra.gmra.mxu1 %v5919_v30  ;;  %3450 = vmatpush1.bf16.msra.mxu0 %v5102_v31  ;;  %v5177_v31 = vld [vmem:[#allocation2 + $0xb60] ss:$16 sps:$4 sm:$0xff]  }
  0xb8   :  { %3491 = vmatpush1.bf16.msra.mxu1 %v5105_v32  ;;  %3451 = vmatprep.subr.bf16.mxu0 %v5110_v33  ;;  %v5182_v32 = vld [vmem:[#allocation2 + $0x944] ss:$16 sps:$4 sm:$0xff]  }
  0xb9   :  { %3492 = vmatprep.subr.bf16.mxu1 %v5113_v34  ;;  %3481 = vmatprep.mubr.bf16.mxu0 %v5935_v41  ;;  %v5185_v33 = vld [vmem:[#allocation2 + $0xb44] ss:$16 sps:$4 sm:$0xff]   ;;  %v660_v34 = vcombine.high %v5924_v6, %v5924_v6 }
  0xba   :  { %3522 = vmatprep.mubr.bf16.mxu1 %v5940_v43 }
  0xbb   :  { %3452 = vmatpush1.bf16.msra.mxu0 %v5108_v37  ;;  %v5183_v37 = vld [vmem:[#allocation2 + $0xb40] ss:$16 sps:$4 sm:$0xff]  }
  0xbc   :  { %3493 = vmatpush1.bf16.msra.mxu1 %v5111_v38  ;;  %3453 = vmatprep.subr.bf16.mxu0 %v5116_v39  ;;  %v5188_v38 = vld [vmem:[#allocation2 + $0x924] ss:$16 sps:$4 sm:$0xff]  }
  0xbd   :  { %3494 = vmatprep.subr.bf16.mxu1 %v5119_v40  ;;  %v5191_v39 = vld [vmem:[#allocation2 + $0xb24] ss:$16 sps:$4 sm:$0xff]   ;;  %v5946_v40 = vrot.slane %v660_v34, %v5875_v49  ;;  %v5249_v34 = vld [vmem:[#allocation2 + $0xfe0] ss:$16 sps:$4 sm:$0xff]  }
  0xbf   :  { %3454 = vmatpush1.bf16.msra.mxu0 %v5114_v44  ;;  %v5186_v44 = vld [vmem:[#allocation2 + $0x920] ss:$16 sps:$4 sm:$0xff]   ;;  %v676_v6 = vcombine.high %v5946_v40, %v5946_v40 }
  0xc0   :  { %3495 = vmatpush1.bf16.msra.mxu1 %v5117_v45  ;;  %3455 = vmatprep.subr.bf16.mxu0 %v5122_v46  ;;  %v5189_v45 = vld [vmem:[#allocation2 + $0xb20] ss:$16 sps:$4 sm:$0xff]   ;;  %v5194_v46 = vld [vmem:[#allocation2 + $0x904] ss:$16 sps:$4 sm:$0xff]  }
  0xc1   :  { %3496 = vmatprep.subr.bf16.mxu1 %v5125_v47  ;;  %v5197_v47 = vld [vmem:[#allocation2 + $0xb04] ss:$16 sps:$4 sm:$0xff]  }
  0xc3   :  { %3456 = vmatpush1.bf16.msra.mxu0 %v5120_v48  ;;  %v5192_v48 = vld [vmem:[#allocation2 + $0x900] ss:$16 sps:$4 sm:$0xff]  }
  0xc4   :  { %3497 = vmatpush1.bf16.msra.mxu1 %v5123_v50  ;;  %3457 = vmatprep.subr.bf16.mxu0 %v5128_v51  ;;  %v5952_v50 = vrot.slane %v5928_v35, %v5875_v49  ;;  %v5195_v51 = vld [vmem:[#allocation2 + $0xb00] ss:$16 sps:$4 sm:$0xff]   ;;  %v5206_v35 = vld [vmem:[#allocation2 + $0xcc4] ss:$16 sps:$4 sm:$0xff]  }
  0xc5   :  { %3498 = vmatprep.subr.bf16.mxu1 %v5131_v52  ;;  %v5200_v52 = vld [vmem:[#allocation2 + $0xce4] ss:$16 sps:$4 sm:$0xff]  }
  0xc7   :  { %3458 = vmatpush1.bf16.msra.mxu0 %v5126_v53  ;;  %v5203_v53 = vld [vmem:[#allocation2 + $0xee4] ss:$16 sps:$4 sm:$0xff]  }
  0xc8   :  { %3499 = vmatpush1.bf16.msra.mxu1 %v5129_v54  ;;  %3459 = vmatprep.subr.bf16.mxu0 %v5134_v55  ;;  %v5955_v54 = vrot.slane %v676_v6, %v5875_v49  ;;  %v5959_v55 = vcombine.high %v5952_v50, %v5952_v50  ;;  %v5266_v6 = vld [vmem:[#allocation2 + $0xd84] ss:$16 sps:$4 sm:$0xff]  }
  0xc9   :  { %3500 = vmatprep.subr.bf16.mxu1 %v5137_v56  ;;  %v5198_v56 = vld [vmem:[#allocation2 + $0xce0] ss:$16 sps:$4 sm:$0xff]  }
  0xcb   :  { %3460 = vmatpush1.bf16.msra.mxu0 %v5132_v57  ;;  %v5201_v57 = vld [vmem:[#allocation2 + $0xee0] ss:$16 sps:$4 sm:$0xff]  }
  0xcc   :  { %3501 = vmatpush1.bf16.msra.mxu1 %v5135_v58  ;;  %3461 = vmatprep.subr.bf16.mxu0 %v5140_v59  ;;  %v5209_v58 = vld [vmem:[#allocation2 + $0xec4] ss:$16 sps:$4 sm:$0xff]   ;;  %v5963_v59 = vcombine.high %v5955_v54, %v5955_v54 }
  0xcd   :  { %3502 = vmatprep.subr.bf16.mxu1 %v5143_v61  ;;  %v5204_v61 = vld [vmem:[#allocation2 + $0xcc0] ss:$16 sps:$4 sm:$0xff]  }
  0xcf   :  { %3462 = vmatpush1.bf16.msra.mxu0 %v5138_v62  ;;  %v5207_v62 = vld [vmem:[#allocation2 + $0xec0] ss:$16 sps:$4 sm:$0xff]  }
  0xd0   :  { %3503 = vmatpush1.bf16.msra.mxu1 %v5141_v63  ;;  %3463 = vmatprep.subr.bf16.mxu0 %v5146_v1  ;;  %v5212_v63 = vld [vmem:[#allocation2 + $0xca4] ss:$16 sps:$4 sm:$0xff]  }
  0xd1   :  { %3504 = vmatprep.subr.bf16.mxu1 %v5149_v2  ;;  %v5215_v1 = vld [vmem:[#allocation2 + $0xea4] ss:$16 sps:$4 sm:$0xff]   ;;  %v5210_v2 = vld [vmem:[#allocation2 + $0xca0] ss:$16 sps:$4 sm:$0xff]  }
  0xd3   :  { %3464 = vmatpush1.bf16.msra.mxu0 %v5144_v3  ;;  %v5213_v3 = vld [vmem:[#allocation2 + $0xea0] ss:$16 sps:$4 sm:$0xff]  }
  0xd4   :  { %3505 = vmatpush1.bf16.msra.mxu1 %v5147_v4  ;;  %3465 = vmatprep.subr.bf16.mxu0 %v5152_v5  ;;  %v5218_v4 = vld [vmem:[#allocation2 + $0xc84] ss:$16 sps:$4 sm:$0xff]  }
  0xd5   :  { %3506 = vmatprep.subr.bf16.mxu1 %v5155_v7  ;;  %v5221_v5 = vld [vmem:[#allocation2 + $0xe84] ss:$16 sps:$4 sm:$0xff]   ;;  %v5216_v7 = vld [vmem:[#allocation2 + $0xc80] ss:$16 sps:$4 sm:$0xff]  }
  0xd7   :  { %3466 = vmatpush2.bf16.msra.mxu0 %v5150_v8  ;;  %v5219_v8 = vld [vmem:[#allocation2 + $0xe80] ss:$16 sps:$4 sm:$0xff]  }
  0xd8   :  { %3507 = vmatpush2.bf16.msra.mxu1 %v5153_v9  ;;  %3467 = vmatprep.subr.bf16.mxu0 %v5158_v10  ;;  %v5224_v9 = vld [vmem:[#allocation2 + $0xc64] ss:$16 sps:$4 sm:$0xff]  }
  0xd9   :  { %3508 = vmatprep.subr.bf16.mxu1 %v5161_v11  ;;  %v5227_v10 = vld [vmem:[#allocation2 + $0xe64] ss:$16 sps:$4 sm:$0xff]   ;;  %v5222_v11 = vld [vmem:[#allocation2 + $0xc60] ss:$16 sps:$4 sm:$0xff]  }
  0xdb   :  { %3468 = vmatpush2.bf16.msra.mxu0 %v5156_v12  ;;  %v5225_v12 = vld [vmem:[#allocation2 + $0xe60] ss:$16 sps:$4 sm:$0xff]  }
  0xdc   :  { %3509 = vmatpush2.bf16.msra.mxu1 %v5159_v14  ;;  %3469 = vmatprep.subr.bf16.mxu0 %v5164_v15  ;;  %v5230_v14 = vld [vmem:[#allocation2 + $0xc44] ss:$16 sps:$4 sm:$0xff]  }
  0xdd   :  { %3510 = vmatprep.subr.bf16.mxu1 %v5167_v16  ;;  %v5233_v15 = vld [vmem:[#allocation2 + $0xe44] ss:$16 sps:$4 sm:$0xff]   ;;  %v5228_v16 = vld [vmem:[#allocation2 + $0xc40] ss:$16 sps:$4 sm:$0xff]  }
  0xdf   :  { %3470 = vmatpush2.bf16.msra.mxu0 %v5162_v19  ;;  %v5231_v19 = vld [vmem:[#allocation2 + $0xe40] ss:$16 sps:$4 sm:$0xff]  }
  0xe0   :  { %3511 = vmatpush2.bf16.msra.mxu1 %v5165_v20  ;;  %3471 = vmatprep.subr.bf16.mxu0 %v5170_v21  ;;  %v5236_v20 = vld [vmem:[#allocation2 + $0xc24] ss:$16 sps:$4 sm:$0xff]  }
  0xe1   :  { %3512 = vmatprep.subr.bf16.mxu1 %v5173_v22  ;;  %v5239_v21 = vld [vmem:[#allocation2 + $0xe24] ss:$16 sps:$4 sm:$0xff]   ;;  %v5234_v22 = vld [vmem:[#allocation2 + $0xc20] ss:$16 sps:$4 sm:$0xff]  }
  0xe3   :  { %3472 = vmatpush2.bf16.msra.mxu0 %v5168_v24  ;;  %v5237_v24 = vld [vmem:[#allocation2 + $0xe20] ss:$16 sps:$4 sm:$0xff]  }
  0xe4   :  { %3513 = vmatpush2.bf16.msra.mxu1 %v5171_v25  ;;  %3473 = vmatprep.subr.bf16.mxu0 %v5176_v27  ;;  %v5242_v25 = vld [vmem:[#allocation2 + $0xc04] ss:$16 sps:$4 sm:$0xff]  }
  0xe5   :  { %3514 = vmatprep.subr.bf16.mxu1 %v5179_v28  ;;  %v5245_v27 = vld [vmem:[#allocation2 + $0xe04] ss:$16 sps:$4 sm:$0xff]   ;;  %v5240_v28 = vld [vmem:[#allocation2 + $0xc00] ss:$16 sps:$4 sm:$0xff]  }
  0xe7   :  { %3474 = vmatpush2.bf16.msra.mxu0 %v5174_v29  ;;  %v5243_v29 = vld [vmem:[#allocation2 + $0xe00] ss:$16 sps:$4 sm:$0xff]  }
  0xe8   :  { %3515 = vmatpush2.bf16.msra.mxu1 %v5177_v31  ;;  %3475 = vmatprep.subr.bf16.mxu0 %v5182_v32  ;;  %v5248_v31 = vld [vmem:[#allocation2 + $0xde4] ss:$16 sps:$4 sm:$0xff]  }
  0xe9   :  { %3516 = vmatprep.subr.bf16.mxu1 %v5185_v33  ;;  %v5251_v32 = vld [vmem:[#allocation2 + $0xfe4] ss:$16 sps:$4 sm:$0xff]   ;;  %v5246_v33 = vld [vmem:[#allocation2 + $0xde0] ss:$16 sps:$4 sm:$0xff]  }
  0xeb   :  { %3476 = vmatpush2.bf16.msra.mxu0 %v5180_v36  ;;  %v5254_v36 = vld [vmem:[#allocation2 + $0xdc4] ss:$16 sps:$4 sm:$0xff]  }
  0xec   :  { %3517 = vmatpush2.bf16.msra.mxu1 %v5183_v37  ;;  %3477 = vmatprep.subr.bf16.mxu0 %v5188_v38  ;;  %v5257_v37 = vld [vmem:[#allocation2 + $0xfc4] ss:$16 sps:$4 sm:$0xff]   ;;  %v5252_v38 = vld [vmem:[#allocation2 + $0xdc0] ss:$16 sps:$4 sm:$0xff]  }
  0xed   :  { %3518 = vmatprep.subr.bf16.mxu1 %v5191_v39  ;;  %v5255_v39 = vld [vmem:[#allocation2 + $0xfc0] ss:$16 sps:$4 sm:$0xff]  }
  0xef   :  { %3478 = vmatpush2.bf16.msra.mxu0 %v5186_v44  ;;  %v5260_v44 = vld [vmem:[#allocation2 + $0xda4] ss:$16 sps:$4 sm:$0xff]  }
  0xf0   :  { %3519 = vmatpush2.bf16.msra.mxu1 %v5189_v45  ;;  %3479 = vmatprep.subr.bf16.mxu0 %v5194_v46  ;;  %v5263_v45 = vld [vmem:[#allocation2 + $0xfa4] ss:$16 sps:$4 sm:$0xff]   ;;  %v5258_v46 = vld [vmem:[#allocation2 + $0xda0] ss:$16 sps:$4 sm:$0xff]  }
  0xf1   :  { %3520 = vmatprep.subr.bf16.mxu1 %v5197_v47  ;;  %v5261_v47 = vld [vmem:[#allocation2 + $0xfa0] ss:$16 sps:$4 sm:$0xff]  }
  0xf3   :  { %3480 = vmatpush2.bf16.msra.mxu0 %v5192_v48  ;;  %v5269_v48 = vld [vmem:[#allocation2 + $0xf84] ss:$16 sps:$4 sm:$0xff]  }
  0xf4   :  { %3521 = vmatpush2.bf16.msra.mxu1 %v5195_v51  ;;  %3531 = vmatprep.subr.bf16.mxu0 %v5200_v52  ;;  %v5264_v51 = vld [vmem:[#allocation2 + $0xd80] ss:$16 sps:$4 sm:$0xff]  }
  0xf5   :  { %3572 = vmatprep.subr.bf16.mxu1 %v5203_v53  ;;  %v5267_v52 = vld [vmem:[#allocation2 + $0xf80] ss:$16 sps:$4 sm:$0xff]   ;;  %v5272_v53 = vld [vmem:[#allocation2 + $0xd64] ss:$16 sps:$4 sm:$0xff]  }
  0xf6   :  { %3482 = vmatmul.mubr.bf16.vlgmr.msra.gmra.mxu0 %v5952_v50 }
  0xf7   :  { %3523 = vmatmul.mubr.bf16.vlgmr.msra.gmra.mxu1 %v5959_v55  ;;  %3532 = vmatpush1.bf16.msra.mxu0 %v5198_v56  ;;  %v5275_v56 = vld [vmem:[#allocation2 + $0xf64] ss:$16 sps:$4 sm:$0xff]  }
  0xf8   :  { %3573 = vmatpush1.bf16.msra.mxu1 %v5201_v57  ;;  %3533 = vmatprep.subr.bf16.mxu0 %v5206_v35  ;;  %v5270_v57 = vld [vmem:[#allocation2 + $0xd60] ss:$16 sps:$4 sm:$0xff]  }
  0xf9   :  { %3574 = vmatprep.subr.bf16.mxu1 %v5209_v58  ;;  %3563 = vmatprep.mubr.bf16.mxu0 %v5955_v54  ;;  %v5273_v35 = vld [vmem:[#allocation2 + $0xf60] ss:$16 sps:$4 sm:$0xff]   ;;  %v5278_v58 = vld [vmem:[#allocation2 + $0xd44] ss:$16 sps:$4 sm:$0xff]  }
  0xfa   :  { %3604 = vmatprep.mubr.bf16.mxu1 %v5963_v59 }
  0xfb   :  { %3534 = vmatpush1.bf16.msra.mxu0 %v5204_v61  ;;  %v5281_v61 = vld [vmem:[#allocation2 + $0xf44] ss:$16 sps:$4 sm:$0xff]  }
  0xfc   :  { %3575 = vmatpush1.bf16.msra.mxu1 %v5207_v62  ;;  %3535 = vmatprep.subr.bf16.mxu0 %v5212_v63  ;;  %v5276_v62 = vld [vmem:[#allocation2 + $0xd40] ss:$16 sps:$4 sm:$0xff]  }
  0xfd   :  { %3576 = vmatprep.subr.bf16.mxu1 %v5215_v1  ;;  %v5279_v63 = vld [vmem:[#allocation2 + $0xf40] ss:$16 sps:$4 sm:$0xff]   ;;  %v5284_v1 = vld [vmem:[#allocation2 + $0xd24] ss:$16 sps:$4 sm:$0xff]  }
  0xff   :  { %3536 = vmatpush1.bf16.msra.mxu0 %v5210_v2  ;;  %v5287_v2 = vld [vmem:[#allocation2 + $0xf24] ss:$16 sps:$4 sm:$0xff]  }
 0x100   :  { %3577 = vmatpush1.bf16.msra.mxu1 %v5213_v3  ;;  %3537 = vmatprep.subr.bf16.mxu0 %v5218_v4  ;;  %v5282_v3 = vld [vmem:[#allocation2 + $0xd20] ss:$16 sps:$4 sm:$0xff]  }
 0x101   :  { %3578 = vmatprep.subr.bf16.mxu1 %v5221_v5  ;;  %v5285_v4 = vld [vmem:[#allocation2 + $0xf20] ss:$16 sps:$4 sm:$0xff]   ;;  %v5290_v5 = vld [vmem:[#allocation2 + $0xd04] ss:$16 sps:$4 sm:$0xff]  }
 0x103   :  { %3538 = vmatpush1.bf16.msra.mxu0 %v5216_v7  ;;  %v5293_v7 = vld [vmem:[#allocation2 + $0xf04] ss:$16 sps:$4 sm:$0xff]  }
 0x104   :  { %3579 = vmatpush1.bf16.msra.mxu1 %v5219_v8  ;;  %3539 = vmatprep.subr.bf16.mxu0 %v5224_v9  ;;  %v5288_v8 = vld [vmem:[#allocation2 + $0xd00] ss:$16 sps:$4 sm:$0xff]  }
 0x105   :  { %3580 = vmatprep.subr.bf16.mxu1 %v5227_v10  ;;  %v5291_v9 = vld [vmem:[#allocation2 + $0xf00] ss:$16 sps:$4 sm:$0xff]   ;;  %v5971_v10 = vrot.slane %v5946_v40, %v5875_v49  ;;  %v5298_v40 = vld [vmem:[#allocation2 + $0x2e8] ss:$16 sps:$4 sm:$0xff]  }
 0x107   :  { %3540 = vmatpush1.bf16.msra.mxu0 %v5222_v11  ;;  %v587_v11 = vld [vmem:[#allocation5] sm:$0xf] }
 0x108   :  { %3581 = vmatpush1.bf16.msra.mxu1 %v5225_v12  ;;  %3541 = vmatprep.subr.bf16.mxu0 %v5230_v14  ;;  %v591_v12 = vsub.s32 0, %v5872_v42  ;;  %v5297_v14 = vld [vmem:[#allocation2 + $0xec] ss:$16 sps:$4 sm:$0xff]  }
 0x109   :  { %3582 = vmatprep.subr.bf16.mxu1 %v5233_v15  ;;  %v5300_v15 = vld [vmem:[#allocation2 + $0x2ec] ss:$16 sps:$4 sm:$0xff]  }
 0x10a   :  { %v592_v49 = vrot.slane %v587_v11, %v591_v12  ;;  %v5348_v12 = vld [vmem:[#allocation2 + $0x3ec] ss:$16 sps:$4 sm:$0xff]  }
 0x10b   :  { %3542 = vmatpush1.bf16.msra.mxu0 %v5228_v16  ;;  %v595_v16 = vsub.s32 1, %v5872_v42 }
 0x10c   :  { %3583 = vmatpush1.bf16.msra.mxu1 %v5231_v19  ;;  %3543 = vmatprep.subr.bf16.mxu0 %v5236_v20  ;;  %v5977_v19 = vcombine.high %v5971_v10, %v5971_v10  ;;  %v5295_v20 = vld [vmem:[#allocation2 + $0xe8] ss:$16 sps:$4 sm:$0xff]  }
 0x10d   :  { %3584 = vmatprep.subr.bf16.mxu1 %v5239_v21  ;;  %v5303_v21 = vld [vmem:[#allocation2 + $0xcc] ss:$16 sps:$4 sm:$0xff]  }
 0x10f   :  { %3544 = vmatpush1.bf16.msra.mxu0 %v5234_v22  ;;  %v5306_v22 = vld [vmem:[#allocation2 + $0x2cc] ss:$16 sps:$4 sm:$0xff]  }
 0x110   :  { %3585 = vmatpush1.bf16.msra.mxu1 %v5237_v24  ;;  %3545 = vmatprep.subr.bf16.mxu0 %v5242_v25  ;;  %v596_v24 = vrot.slane %v587_v11, %v595_v16  ;;  %v5345_v11 = vld [vmem:[#allocation2 + $0x1ec] ss:$16 sps:$4 sm:$0xff]  }
 0x111   :  { %3586 = vmatprep.subr.bf16.mxu1 %v5245_v27  ;;  %v5351_v16 = vld [vmem:[#allocation2 + $0x1cc] ss:$16 sps:$4 sm:$0xff]  }
 0x113   :  { %3546 = vmatpush1.bf16.msra.mxu0 %v5240_v28  ;;  %v5301_v28 = vld [vmem:[#allocation2 + $0xc8] ss:$16 sps:$4 sm:$0xff]  }
 0x114   :  { %3587 = vmatpush1.bf16.msra.mxu1 %v5243_v29  ;;  %3547 = vmatprep.subr.bf16.mxu0 %v5248_v31  ;;  %v5304_v29 = vld [vmem:[#allocation2 + $0x2c8] ss:$16 sps:$4 sm:$0xff]  }
 0x115   :  { %3588 = vmatprep.subr.bf16.mxu1 %v5251_v32 }
 0x117   :  { %3548 = vmatpush2.bf16.msra.mxu0 %v5246_v33 }
 0x118   :  { %3589 = vmatpush2.bf16.msra.mxu1 %v5249_v34  ;;  %3549 = vmatprep.subr.bf16.mxu0 %v5254_v36  ;;  %v5309_v34 = vld [vmem:[#allocation2 + $0xac] ss:$16 sps:$4 sm:$0xff]  }
 0x119   :  { %3590 = vmatprep.subr.bf16.mxu1 %v5257_v37  ;;  %v5312_v36 = vld [vmem:[#allocation2 + $0x2ac] ss:$16 sps:$4 sm:$0xff]  }
 0x11b   :  { %3550 = vmatpush2.bf16.msra.mxu0 %v5252_v38 }
 0x11c   :  { %3591 = vmatpush2.bf16.msra.mxu1 %v5255_v39  ;;  %3551 = vmatprep.subr.bf16.mxu0 %v5260_v44  ;;  %v5307_v39 = vld [vmem:[#allocation2 + $0xa8] ss:$16 sps:$4 sm:$0xff]  }
 0x11d   :  { %3592 = vmatprep.subr.bf16.mxu1 %v5263_v45  ;;  %v5310_v44 = vld [vmem:[#allocation2 + $0x2a8] ss:$16 sps:$4 sm:$0xff]  }
 0x11f   :  { %3552 = vmatpush2.bf16.msra.mxu0 %v5258_v46 }
 0x120   :  { %3593 = vmatpush2.bf16.msra.mxu1 %v5261_v47  ;;  %3553 = vmatprep.subr.bf16.mxu0 %v5266_v6 }
 0x121   :  { %3594 = vmatprep.subr.bf16.mxu1 %v5269_v48 }
 0x123   :  { %3554 = vmatpush2.bf16.msra.mxu0 %v5264_v51  ;;  %v5315_v51 = vld [vmem:[#allocation2 + $0x8c] ss:$16 sps:$4 sm:$0xff]  }
 0x124   :  { %3595 = vmatpush2.bf16.msra.mxu1 %v5267_v52  ;;  %3555 = vmatprep.subr.bf16.mxu0 %v5272_v53  ;;  %v5318_v52 = vld [vmem:[#allocation2 + $0x28c] ss:$16 sps:$4 sm:$0xff]   ;;  %v5313_v53 = vld [vmem:[#allocation2 + $0x88] ss:$16 sps:$4 sm:$0xff]  }
 0x125   :  { %3596 = vmatprep.subr.bf16.mxu1 %v5275_v56  ;;  %v5316_v56 = vld [vmem:[#allocation2 + $0x288] ss:$16 sps:$4 sm:$0xff]  }
 0x127   :  { %3556 = vmatpush2.bf16.msra.mxu0 %v5270_v57  ;;  %v5319_v57 = vld [vmem:[#allocation2 + $0x68] ss:$16 sps:$4 sm:$0xff]  }
 0x128   :  { %3597 = vmatpush2.bf16.msra.mxu1 %v5273_v35  ;;  %3557 = vmatprep.subr.bf16.mxu0 %v5278_v58  ;;  %v5322_v35 = vld [vmem:[#allocation2 + $0x268] ss:$16 sps:$4 sm:$0xff]   ;;  %v5327_v58 = vld [vmem:[#allocation2 + $0x4c] ss:$16 sps:$4 sm:$0xff]  }
 0x129   :  { %3598 = vmatprep.subr.bf16.mxu1 %v5281_v61  ;;  %v5330_v61 = vld [vmem:[#allocation2 + $0x24c] ss:$16 sps:$4 sm:$0xff]  }
 0x12b   :  { %3558 = vmatpush2.bf16.msra.mxu0 %v5276_v62  ;;  %v5325_v62 = vld [vmem:[#allocation2 + $0x48] ss:$16 sps:$4 sm:$0xff]  }
 0x12c   :  { %3599 = vmatpush2.bf16.msra.mxu1 %v5279_v63  ;;  %3559 = vmatprep.subr.bf16.mxu0 %v5284_v1  ;;  %v5328_v63 = vld [vmem:[#allocation2 + $0x248] ss:$16 sps:$4 sm:$0xff]   ;;  %v5333_v1 = vld [vmem:[#allocation2 + $0x2c] ss:$16 sps:$4 sm:$0xff]  }
 0x12d   :  { %3600 = vmatprep.subr.bf16.mxu1 %v5287_v2  ;;  %v5336_v2 = vld [vmem:[#allocation2 + $0x22c] ss:$16 sps:$4 sm:$0xff]  }
 0x12f   :  { %3560 = vmatpush2.bf16.msra.mxu0 %v5282_v3  ;;  %v5331_v3 = vld [vmem:[#allocation2 + $0x28] ss:$16 sps:$4 sm:$0xff]  }
 0x130   :  { %3601 = vmatpush2.bf16.msra.mxu1 %v5285_v4  ;;  %3561 = vmatprep.subr.bf16.mxu0 %v5290_v5  ;;  %v5334_v4 = vld [vmem:[#allocation2 + $0x228] ss:$16 sps:$4 sm:$0xff]   ;;  %v5339_v5 = vld [vmem:[#allocation2 + $0xc] ss:$16 sps:$4 sm:$0xff]  }
 0x131   :  { %3602 = vmatprep.subr.bf16.mxu1 %v5293_v7  ;;  %v5342_v7 = vld [vmem:[#allocation2 + $0x20c] ss:$16 sps:$4 sm:$0xff]  }
 0x133   :  { %3562 = vmatpush2.bf16.msra.mxu0 %v5288_v8  ;;  %v5337_v8 = vld [vmem:[#allocation2 + $0x8] ss:$16 sps:$4 sm:$0xff]  }
 0x134   :  { %3603 = vmatpush2.bf16.msra.mxu1 %v5291_v9  ;;  %3613 = vmatprep.subr.bf16.mxu0 %v5297_v14  ;;  %v5340_v9 = vld [vmem:[#allocation2 + $0x208] ss:$16 sps:$4 sm:$0xff]  }
 0x135   :  { %3654 = vmatprep.subr.bf16.mxu1 %v5300_v15  ;;  %v5343_v14 = vld [vmem:[#allocation2 + $0x1e8] ss:$16 sps:$4 sm:$0xff]  }
 0x136   :  { %v3319_v25 = vpop.f32.mrf.mxu0  ;;  %3564 = vmatmul.mubr.bf16.vlgmr.msra.gmra.mxu0 %v5971_v10  ;;  %v5346_v15 = vld [vmem:[#allocation2 + $0x3e8] ss:$16 sps:$4 sm:$0xff]  }
 0x137   :  { %v3360_v27 = vpop.f32.mrf.mxu1  ;;  %3605 = vmatmul.mubr.bf16.vlgmr.msra.gmra.mxu1 %v5977_v19  ;;  %v3320_v31 = vadd.f32 %v3319_v25, %v592_v49  ;;  %3614 = vmatpush1.bf16.msra.mxu0 %v5295_v20  ;;  %v5354_v20 = vld [vmem:[#allocation2 + $0x3cc] ss:$16 sps:$4 sm:$0xff]   ;;  %v5349_v49 = vld [vmem:[#allocation2 + $0x1c8] ss:$16 sps:$4 sm:$0xff]  }
 0x138   :  { %3655 = vmatpush1.bf16.msra.mxu1 %v5298_v40  ;;  %v3321_v32 = vpop.f32.mrf.mxu0  ;;  %3615 = vmatprep.subr.bf16.mxu0 %v5303_v21  ;;  %v5352_v40 = vld [vmem:[#allocation2 + $0x3c8] ss:$16 sps:$4 sm:$0xff]   ;;  %v5357_v21 = vld [vmem:[#allocation2 + $0x1ac] ss:$16 sps:$4 sm:$0xff]  }
 0x139   :  { %v3362_v33 = vpop.f32.mrf.mxu1  ;;  %3656 = vmatprep.subr.bf16.mxu1 %v5306_v22  ;;  %v5981_v37 = vadd.f32 %v3360_v27, %v3320_v31  ;;  %v3322_v38 = vadd.f32 %v3321_v32, %v596_v24  ;;  %3645 = vmatprep.mubr.bf16.mxu0 %v5882_v60  ;;  %v5321_v60 = vld [vmem:[#allocation2 + $0x6c] ss:$16 sps:$4 sm:$0xff]   ;;  %v5355_v24 = vld [vmem:[#allocation2 + $0x1a8] ss:$16 sps:$4 sm:$0xff]  }
 0x13a   :  { %3686 = vmatprep.mubr.bf16.mxu1 %v5886_v0  ;;  %v3323_v45 = vpop.f32.mrf.mxu0  ;;  %v5324_v0 = vld [vmem:[#allocation2 + $0x26c] ss:$16 sps:$4 sm:$0xff]   ;;  %v5358_v25 = vld [vmem:[#allocation2 + $0x3a8] ss:$16 sps:$4 sm:$0xff]  }
 0x13b   :  { %v3364_v46 = vpop.f32.mrf.mxu1  ;;  %v5985_v47 = vadd.f32 %v3362_v33, %v3322_v38  ;;  %3616 = vmatpush1.bf16.msra.mxu0 %v5301_v28  ;;  %v5360_v22 = vld [vmem:[#allocation2 + $0x3ac] ss:$16 sps:$4 sm:$0xff]   ;;  %v5364_v31 = vld [vmem:[#allocation2 + $0x388] ss:$16 sps:$4 sm:$0xff]  }
 0x13c   :  { %3657 = vmatpush1.bf16.msra.mxu1 %v5304_v29  ;;  %v3324_v6 = vpop.f32.mrf.mxu0  ;;  %3617 = vmatprep.subr.bf16.mxu0 %v5309_v34  ;;  %v5363_v27 = vld [vmem:[#allocation2 + $0x18c] ss:$16 sps:$4 sm:$0xff]   ;;  %v5361_v29 = vld [vmem:[#allocation2 + $0x188] ss:$16 sps:$4 sm:$0xff]  }
 0x13d   :  { %v3365_v48 = vpop.f32.mrf.mxu1  ;;  %3658 = vmatprep.subr.bf16.mxu1 %v5312_v36  ;;  %v5366_v28 = vld [vmem:[#allocation2 + $0x38c] ss:$16 sps:$4 sm:$0xff]   ;;  %v5367_v34 = vld [vmem:[#allocation2 + $0x168] ss:$16 sps:$4 sm:$0xff]  }
 0x13e   :  { %v5369_v32 = vld [vmem:[#allocation2 + $0x16c] ss:$16 sps:$4 sm:$0xff]   ;;  %v5370_v36 = vld [vmem:[#allocation2 + $0x368] ss:$16 sps:$4 sm:$0xff]  }
 0x13f   :  { %3618 = vmatpush1.bf16.msra.mxu0 %v5307_v39  ;;  %v5372_v33 = vld [vmem:[#allocation2 + $0x36c] ss:$16 sps:$4 sm:$0xff]   ;;  %v5376_v45 = vld [vmem:[#allocation2 + $0x348] ss:$16 sps:$4 sm:$0xff]  }
 0x140   :  { %3659 = vmatpush1.bf16.msra.mxu1 %v5310_v44  ;;  %3619 = vmatprep.subr.bf16.mxu0 %v5315_v51  ;;  %v5375_v38 = vld [vmem:[#allocation2 + $0x14c] ss:$16 sps:$4 sm:$0xff]   ;;  %v5373_v44 = vld [vmem:[#allocation2 + $0x148] ss:$16 sps:$4 sm:$0xff]  }
 0x141   :  { %3660 = vmatprep.subr.bf16.mxu1 %v5318_v52  ;;  %v5378_v39 = vld [vmem:[#allocation2 + $0x34c] ss:$16 sps:$4 sm:$0xff]   ;;  %v5379_v48 = vld [vmem:[#allocation2 + $0x128] ss:$16 sps:$4 sm:$0xff]  }
 0x142   :  { %v5381_v46 = vld [vmem:[#allocation2 + $0x12c] ss:$16 sps:$4 sm:$0xff]   ;;  %v5382_v51 = vld [vmem:[#allocation2 + $0x328] ss:$16 sps:$4 sm:$0xff]  }
 0x143   :  { %3620 = vmatpush1.bf16.msra.mxu0 %v5313_v53  ;;  %v5384_v6 = vld [vmem:[#allocation2 + $0x32c] ss:$16 sps:$4 sm:$0xff]  }
 0x144   :  { %3661 = vmatpush1.bf16.msra.mxu1 %v5316_v56  ;;  %3621 = vmatprep.subr.bf16.mxu0 %v5321_v60  ;;  %v5387_v52 = vld [vmem:[#allocation2 + $0x10c] ss:$16 sps:$4 sm:$0xff]   ;;  %v5385_v56 = vld [vmem:[#allocation2 + $0x108] ss:$16 sps:$4 sm:$0xff]  }
 0x145   :  { %3662 = vmatprep.subr.bf16.mxu1 %v5324_v0  ;;  %v5390_v53 = vld [vmem:[#allocation2 + $0x30c] ss:$16 sps:$4 sm:$0xff]   ;;  %v5388_v60 = vld [vmem:[#allocation2 + $0x308] ss:$16 sps:$4 sm:$0xff]  }
 0x146   :  { %v5393_v0 = vld [vmem:[#allocation2 + $0x4ec] ss:$16 sps:$4 sm:$0xff]  }
 0x147   :  { %3622 = vmatpush1.bf16.msra.mxu0 %v5319_v57  ;;  %v5396_v57 = vld [vmem:[#allocation2 + $0x6ec] ss:$16 sps:$4 sm:$0xff]  }
 0x148   :  { %3663 = vmatpush1.bf16.msra.mxu1 %v5322_v35  ;;  %3623 = vmatprep.subr.bf16.mxu0 %v5327_v58  ;;  %v5391_v35 = vld [vmem:[#allocation2 + $0x4e8] ss:$16 sps:$4 sm:$0xff]  }
 0x149   :  { %3664 = vmatprep.subr.bf16.mxu1 %v5330_v61  ;;  %v5394_v58 = vld [vmem:[#allocation2 + $0x6e8] ss:$16 sps:$4 sm:$0xff]   ;;  %v5399_v61 = vld [vmem:[#allocation2 + $0x4cc] ss:$16 sps:$4 sm:$0xff]  }
 0x14b   :  { %3624 = vmatpush1.bf16.msra.mxu0 %v5325_v62  ;;  %v5402_v62 = vld [vmem:[#allocation2 + $0x6cc] ss:$16 sps:$4 sm:$0xff]  }
 0x14c   :  { %3665 = vmatpush1.bf16.msra.mxu1 %v5328_v63  ;;  %3625 = vmatprep.subr.bf16.mxu0 %v5333_v1  ;;  %v5397_v63 = vld [vmem:[#allocation2 + $0x4c8] ss:$16 sps:$4 sm:$0xff]  }
 0x14d   :  { %3666 = vmatprep.subr.bf16.mxu1 %v5336_v2  ;;  %v5400_v1 = vld [vmem:[#allocation2 + $0x6c8] ss:$16 sps:$4 sm:$0xff]  }
 0x14f   :  { %3626 = vmatpush1.bf16.msra.mxu0 %v5331_v3 }
 0x150   :  { %3667 = vmatpush1.bf16.msra.mxu1 %v5334_v4  ;;  %3627 = vmatprep.subr.bf16.mxu0 %v5339_v5 }
 0x151   :  { %3668 = vmatprep.subr.bf16.mxu1 %v5342_v7 }
 0x153   :  { %3628 = vmatpush1.bf16.msra.mxu0 %v5337_v8  ;;  %v5405_v8 = vld [vmem:[#allocation2 + $0x4ac] ss:$16 sps:$4 sm:$0xff]  }
 0x154   :  { %3669 = vmatpush1.bf16.msra.mxu1 %v5340_v9  ;;  %3629 = vmatprep.subr.bf16.mxu0 %v5345_v11  ;;  %v5408_v9 = vld [vmem:[#allocation2 + $0x6ac] ss:$16 sps:$4 sm:$0xff]  }
 0x155   :  { %3670 = vmatprep.subr.bf16.mxu1 %v5348_v12 }
 0x157   :  { %3630 = vmatpush2.bf16.msra.mxu0 %v5343_v14  ;;  %v5403_v14 = vld [vmem:[#allocation2 + $0x4a8] ss:$16 sps:$4 sm:$0xff]  }
 0x158   :  { %3671 = vmatpush2.bf16.msra.mxu1 %v5346_v15  ;;  %3631 = vmatprep.subr.bf16.mxu0 %v5351_v16  ;;  %v5406_v15 = vld [vmem:[#allocation2 + $0x6a8] ss:$16 sps:$4 sm:$0xff]  }
 0x159   :  { %3672 = vmatprep.subr.bf16.mxu1 %v5354_v20 }
 0x15b   :  { %3632 = vmatpush2.bf16.msra.mxu0 %v5349_v49  ;;  %v5411_v49 = vld [vmem:[#allocation2 + $0x48c] ss:$16 sps:$4 sm:$0xff]  }
 0x15c   :  { %3673 = vmatpush2.bf16.msra.mxu1 %v5352_v40  ;;  %3633 = vmatprep.subr.bf16.mxu0 %v5357_v21  ;;  %v5414_v40 = vld [vmem:[#allocation2 + $0x68c] ss:$16 sps:$4 sm:$0xff]   ;;  %v5412_v21 = vld [vmem:[#allocation2 + $0x688] ss:$16 sps:$4 sm:$0xff]  }
 0x15d   :  { %3674 = vmatprep.subr.bf16.mxu1 %v5360_v22  ;;  %v5415_v22 = vld [vmem:[#allocation2 + $0x468] ss:$16 sps:$4 sm:$0xff]  }
 0x15f   :  { %3634 = vmatpush2.bf16.msra.mxu0 %v5355_v24  ;;  %v5418_v24 = vld [vmem:[#allocation2 + $0x668] ss:$16 sps:$4 sm:$0xff]  }
 0x160   :  { %3675 = vmatpush2.bf16.msra.mxu1 %v5358_v25  ;;  %3635 = vmatprep.subr.bf16.mxu0 %v5363_v27  ;;  %v5423_v25 = vld [vmem:[#allocation2 + $0x44c] ss:$16 sps:$4 sm:$0xff]  }
 0x161   :  { %3676 = vmatprep.subr.bf16.mxu1 %v5366_v28  ;;  %v5426_v27 = vld [vmem:[#allocation2 + $0x64c] ss:$16 sps:$4 sm:$0xff]   ;;  %v5421_v28 = vld [vmem:[#allocation2 + $0x448] ss:$16 sps:$4 sm:$0xff]  }
 0x163   :  { %3636 = vmatpush2.bf16.msra.mxu0 %v5361_v29  ;;  %v5424_v29 = vld [vmem:[#allocation2 + $0x648] ss:$16 sps:$4 sm:$0xff]  }
 0x164   :  { %3677 = vmatpush2.bf16.msra.mxu1 %v5364_v31  ;;  %3637 = vmatprep.subr.bf16.mxu0 %v5369_v32  ;;  %v5429_v31 = vld [vmem:[#allocation2 + $0x42c] ss:$16 sps:$4 sm:$0xff]  }
 0x165   :  { %3678 = vmatprep.subr.bf16.mxu1 %v5372_v33  ;;  %v5432_v32 = vld [vmem:[#allocation2 + $0x62c] ss:$16 sps:$4 sm:$0xff]   ;;  %v5427_v33 = vld [vmem:[#allocation2 + $0x428] ss:$16 sps:$4 sm:$0xff]  }
 0x167   :  { %3638 = vmatpush2.bf16.msra.mxu0 %v5367_v34  ;;  %v5430_v34 = vld [vmem:[#allocation2 + $0x628] ss:$16 sps:$4 sm:$0xff]  }
 0x168   :  { %3679 = vmatpush2.bf16.msra.mxu1 %v5370_v36  ;;  %3639 = vmatprep.subr.bf16.mxu0 %v5375_v38  ;;  %v5435_v36 = vld [vmem:[#allocation2 + $0x40c] ss:$16 sps:$4 sm:$0xff]  }
 0x169   :  { %3680 = vmatprep.subr.bf16.mxu1 %v5378_v39  ;;  %v5438_v38 = vld [vmem:[#allocation2 + $0x60c] ss:$16 sps:$4 sm:$0xff]   ;;  %v5433_v39 = vld [vmem:[#allocation2 + $0x408] ss:$16 sps:$4 sm:$0xff]  }
 0x16b   :  { %3640 = vmatpush2.bf16.msra.mxu0 %v5373_v44  ;;  %v5436_v44 = vld [vmem:[#allocation2 + $0x608] ss:$16 sps:$4 sm:$0xff]  }
 0x16c   :  { %3681 = vmatpush2.bf16.msra.mxu1 %v5376_v45  ;;  %3641 = vmatprep.subr.bf16.mxu0 %v5381_v46  ;;  %v5441_v45 = vld [vmem:[#allocation2 + $0x5ec] ss:$16 sps:$4 sm:$0xff]  }
 0x16d   :  { %3682 = vmatprep.subr.bf16.mxu1 %v5384_v6  ;;  %v5444_v46 = vld [vmem:[#allocation2 + $0x7ec] ss:$16 sps:$4 sm:$0xff]   ;;  %v5439_v6 = vld [vmem:[#allocation2 + $0x5e8] ss:$16 sps:$4 sm:$0xff]  }
 0x16f   :  { %3642 = vmatpush2.bf16.msra.mxu0 %v5379_v48  ;;  %v5442_v48 = vld [vmem:[#allocation2 + $0x7e8] ss:$16 sps:$4 sm:$0xff]  }
 0x170   :  { %3683 = vmatpush2.bf16.msra.mxu1 %v5382_v51  ;;  %3643 = vmatprep.subr.bf16.mxu0 %v5387_v52  ;;  %v5447_v51 = vld [vmem:[#allocation2 + $0x5cc] ss:$16 sps:$4 sm:$0xff]  }
 0x171   :  { %3684 = vmatprep.subr.bf16.mxu1 %v5390_v53  ;;  %v5450_v52 = vld [vmem:[#allocation2 + $0x7cc] ss:$16 sps:$4 sm:$0xff]   ;;  %v5445_v53 = vld [vmem:[#allocation2 + $0x5c8] ss:$16 sps:$4 sm:$0xff]  }
 0x173   :  { %3644 = vmatpush2.bf16.msra.mxu0 %v5385_v56  ;;  %v5448_v56 = vld [vmem:[#allocation2 + $0x7c8] ss:$16 sps:$4 sm:$0xff]  }
 0x174   :  { %3685 = vmatpush2.bf16.msra.mxu1 %v5388_v60  ;;  %3695 = vmatprep.subr.bf16.mxu0 %v5393_v0  ;;  %v5453_v60 = vld [vmem:[#allocation2 + $0x5ac] ss:$16 sps:$4 sm:$0xff]  }
 0x175   :  { %3736 = vmatprep.subr.bf16.mxu1 %v5396_v57  ;;  %v5456_v0 = vld [vmem:[#allocation2 + $0x7ac] ss:$16 sps:$4 sm:$0xff]   ;;  %v5451_v57 = vld [vmem:[#allocation2 + $0x5a8] ss:$16 sps:$4 sm:$0xff]  }
 0x176   :  { %v3401_v2 = vpop.f32.mrf.mxu0  ;;  %3646 = vmatmul.mubr.bf16.vlgmr.msra.gmra.mxu0 %v5896_v13 }
 0x177   :  { %v3442_v3 = vpop.f32.mrf.mxu1  ;;  %3687 = vmatmul.mubr.bf16.vlgmr.msra.gmra.mxu1 %v5903_v18  ;;  %v3402_v4 = vadd.f32 %v3401_v2, %v5981_v37  ;;  %3696 = vmatpush1.bf16.msra.mxu0 %v5391_v35  ;;  %v5454_v35 = vld [vmem:[#allocation2 + $0x7a8] ss:$16 sps:$4 sm:$0xff]   ;;  %v5468_v2 = vld [vmem:[#allocation2 + $0x76c] ss:$16 sps:$4 sm:$0xff]  }
 0x178   :  { %3737 = vmatpush1.bf16.msra.mxu1 %v5394_v58  ;;  %v3403_v5 = vpop.f32.mrf.mxu0  ;;  %3697 = vmatprep.subr.bf16.mxu0 %v5399_v61  ;;  %v5459_v58 = vld [vmem:[#allocation2 + $0x58c] ss:$16 sps:$4 sm:$0xff]  }
 0x179   :  { %v3444_v7 = vpop.f32.mrf.mxu1  ;;  %3738 = vmatprep.subr.bf16.mxu1 %v5402_v62  ;;  %v5990_v11 = vadd.f32 %v3442_v3, %v3402_v4  ;;  %v3404_v12 = vadd.f32 %v3403_v5, %v5985_v47  ;;  %3727 = vmatprep.mubr.bf16.mxu0 %v5899_v17  ;;  %v5409_v47 = vld [vmem:[#allocation2 + $0x488] ss:$16 sps:$4 sm:$0xff]   ;;  %v5417_v17 = vld [vmem:[#allocation2 + $0x46c] ss:$16 sps:$4 sm:$0xff]  }
 0x17a   :  { %3768 = vmatprep.mubr.bf16.mxu1 %v5907_v23  ;;  %v3405_v13 = vpop.f32.mrf.mxu0  ;;  %v5420_v23 = vld [vmem:[#allocation2 + $0x66c] ss:$16 sps:$4 sm:$0xff]   ;;  %v5457_v62 = vld [vmem:[#allocation2 + $0x588] ss:$16 sps:$4 sm:$0xff]  }
 0x17b   :  { %v3446_v18 = vpop.f32.mrf.mxu1  ;;  %v5995_v37 = vadd.f32 %v3444_v7, %v3404_v12  ;;  %3698 = vmatpush1.bf16.msra.mxu0 %v5397_v63  ;;  %v5462_v61 = vld [vmem:[#allocation2 + $0x78c] ss:$16 sps:$4 sm:$0xff]   ;;  %v5460_v63 = vld [vmem:[#allocation2 + $0x788] ss:$16 sps:$4 sm:$0xff]  }
 0x17c   :  { %3739 = vmatpush1.bf16.msra.mxu1 %v5400_v1  ;;  %v3406_v16 = vpop.f32.mrf.mxu0  ;;  %3699 = vmatprep.subr.bf16.mxu0 %v5405_v8  ;;  %v5465_v1 = vld [vmem:[#allocation2 + $0x56c] ss:$16 sps:$4 sm:$0xff]   ;;  %v5463_v3 = vld [vmem:[#allocation2 + $0x568] ss:$16 sps:$4 sm:$0xff]  }
 0x17d   :  { %v3447_v20 = vpop.f32.mrf.mxu1  ;;  %3740 = vmatprep.subr.bf16.mxu1 %v5408_v9  ;;  %v5466_v4 = vld [vmem:[#allocation2 + $0x768] ss:$16 sps:$4 sm:$0xff]   ;;  %v5471_v5 = vld [vmem:[#allocation2 + $0x54c] ss:$16 sps:$4 sm:$0xff]  }
 0x17e   :  { %v5474_v7 = vld [vmem:[#allocation2 + $0x74c] ss:$16 sps:$4 sm:$0xff]   ;;  %v5469_v8 = vld [vmem:[#allocation2 + $0x548] ss:$16 sps:$4 sm:$0xff]  }
 0x17f   :  { %3700 = vmatpush1.bf16.msra.mxu0 %v5403_v14  ;;  %v5472_v9 = vld [vmem:[#allocation2 + $0x748] ss:$16 sps:$4 sm:$0xff]   ;;  %v5477_v12 = vld [vmem:[#allocation2 + $0x52c] ss:$16 sps:$4 sm:$0xff]  }
 0x180   :  { %3741 = vmatpush1.bf16.msra.mxu1 %v5406_v15  ;;  %3701 = vmatprep.subr.bf16.mxu0 %v5411_v49  ;;  %v5480_v14 = vld [vmem:[#allocation2 + $0x72c] ss:$16 sps:$4 sm:$0xff]   ;;  %v5475_v15 = vld [vmem:[#allocation2 + $0x528] ss:$16 sps:$4 sm:$0xff]  }
 0x181   :  { %3742 = vmatprep.subr.bf16.mxu1 %v5414_v40  ;;  %v5478_v13 = vld [vmem:[#allocation2 + $0x728] ss:$16 sps:$4 sm:$0xff]   ;;  %v5483_v18 = vld [vmem:[#allocation2 + $0x50c] ss:$16 sps:$4 sm:$0xff]  }
 0x182   :  { %v5486_v16 = vld [vmem:[#allocation2 + $0x70c] ss:$16 sps:$4 sm:$0xff]   ;;  %v5481_v20 = vld [vmem:[#allocation2 + $0x508] ss:$16 sps:$4 sm:$0xff]  }
 0x183   :  { %3702 = vmatpush1.bf16.msra.mxu0 %v5409_v47  ;;  %v5484_v49 = vld [vmem:[#allocation2 + $0x708] ss:$16 sps:$4 sm:$0xff]   ;;  %v5489_v40 = vld [vmem:[#allocation2 + $0x8ec] ss:$16 sps:$4 sm:$0xff]  }
 0x184   :  { %3743 = vmatpush1.bf16.msra.mxu1 %v5412_v21  ;;  %3703 = vmatprep.subr.bf16.mxu0 %v5417_v17  ;;  %v5492_v47 = vld [vmem:[#allocation2 + $0xaec] ss:$16 sps:$4 sm:$0xff]   ;;  %v5487_v21 = vld [vmem:[#allocation2 + $0x8e8] ss:$16 sps:$4 sm:$0xff]  }
 0x185   :  { %3744 = vmatprep.subr.bf16.mxu1 %v5420_v23  ;;  %v5490_v17 = vld [vmem:[#allocation2 + $0xae8] ss:$16 sps:$4 sm:$0xff]   ;;  %v5495_v23 = vld [vmem:[#allocation2 + $0x8cc] ss:$16 sps:$4 sm:$0xff]  }
 0x187   :  { %3704 = vmatpush1.bf16.msra.mxu0 %v5415_v22  ;;  %v5498_v22 = vld [vmem:[#allocation2 + $0xacc] ss:$16 sps:$4 sm:$0xff]  }
 0x188   :  { %3745 = vmatpush1.bf16.msra.mxu1 %v5418_v24  ;;  %3705 = vmatprep.subr.bf16.mxu0 %v5423_v25 }
 0x189   :  { %3746 = vmatprep.subr.bf16.mxu1 %v5426_v27 }
 0x18b   :  { %3706 = vmatpush1.bf16.msra.mxu0 %v5421_v28  ;;  %v5493_v28 = vld [vmem:[#allocation2 + $0x8c8] ss:$16 sps:$4 sm:$0xff]  }
 0x18c   :  { %3747 = vmatpush1.bf16.msra.mxu1 %v5424_v29  ;;  %3707 = vmatprep.subr.bf16.mxu0 %v5429_v31  ;;  %v5496_v29 = vld [vmem:[#allocation2 + $0xac8] ss:$16 sps:$4 sm:$0xff]  }
 0x18d   :  { %3748 = vmatprep.subr.bf16.mxu1 %v5432_v32 }
 0x18f   :  { %3708 = vmatpush1.bf16.msra.mxu0 %v5427_v33  ;;  %v5501_v33 = vld [vmem:[#allocation2 + $0x8ac] ss:$16 sps:$4 sm:$0xff]  }
 0x190   :  { %3749 = vmatpush1.bf16.msra.mxu1 %v5430_v34  ;;  %3709 = vmatprep.subr.bf16.mxu0 %v5435_v36  ;;  %v5504_v34 = vld [vmem:[#allocation2 + $0xaac] ss:$16 sps:$4 sm:$0xff]  }
 0x191   :  { %3750 = vmatprep.subr.bf16.mxu1 %v5438_v38 }
 0x193   :  { %3710 = vmatpush1.bf16.msra.mxu0 %v5433_v39  ;;  %v5499_v39 = vld [vmem:[#allocation2 + $0x8a8] ss:$16 sps:$4 sm:$0xff]  }
 0x194   :  { %3751 = vmatpush1.bf16.msra.mxu1 %v5436_v44  ;;  %3711 = vmatprep.subr.bf16.mxu0 %v5441_v45  ;;  %v5502_v44 = vld [vmem:[#allocation2 + $0xaa8] ss:$16 sps:$4 sm:$0xff]  }
 0x195   :  { %3752 = vmatprep.subr.bf16.mxu1 %v5444_v46 }
 0x197   :  { %3712 = vmatpush2.bf16.msra.mxu0 %v5439_v6  ;;  %v5507_v6 = vld [vmem:[#allocation2 + $0x88c] ss:$16 sps:$4 sm:$0xff]  }
 0x198   :  { %3753 = vmatpush2.bf16.msra.mxu1 %v5442_v48  ;;  %3713 = vmatprep.subr.bf16.mxu0 %v5447_v51  ;;  %v5510_v48 = vld [vmem:[#allocation2 + $0xa8c] ss:$16 sps:$4 sm:$0xff]  }
 0x199   :  { %3754 = vmatprep.subr.bf16.mxu1 %v5450_v52  ;;  %v5516_v51 = vld [vmem:[#allocation2 + $0xa6c] ss:$16 sps:$4 sm:$0xff]   ;;  %v5511_v52 = vld [vmem:[#allocation2 + $0x868] ss:$16 sps:$4 sm:$0xff]  }
 0x19b   :  { %3714 = vmatpush2.bf16.msra.mxu0 %v5445_v53  ;;  %v5514_v53 = vld [vmem:[#allocation2 + $0xa68] ss:$16 sps:$4 sm:$0xff]  }
 0x19c   :  { %3755 = vmatpush2.bf16.msra.mxu1 %v5448_v56  ;;  %3715 = vmatprep.subr.bf16.mxu0 %v5453_v60  ;;  %v5519_v56 = vld [vmem:[#allocation2 + $0x84c] ss:$16 sps:$4 sm:$0xff]  }
 0x19d   :  { %3756 = vmatprep.subr.bf16.mxu1 %v5456_v0  ;;  %v5522_v60 = vld [vmem:[#allocation2 + $0xa4c] ss:$16 sps:$4 sm:$0xff]   ;;  %v5517_v0 = vld [vmem:[#allocation2 + $0x848] ss:$16 sps:$4 sm:$0xff]  }
 0x19f   :  { %3716 = vmatpush2.bf16.msra.mxu0 %v5451_v57  ;;  %v5520_v57 = vld [vmem:[#allocation2 + $0xa48] ss:$16 sps:$4 sm:$0xff]  }
 0x1a0   :  { %3757 = vmatpush2.bf16.msra.mxu1 %v5454_v35  ;;  %3717 = vmatprep.subr.bf16.mxu0 %v5459_v58  ;;  %v5525_v35 = vld [vmem:[#allocation2 + $0x82c] ss:$16 sps:$4 sm:$0xff]  }
 0x1a1   :  { %3758 = vmatprep.subr.bf16.mxu1 %v5462_v61  ;;  %v5528_v58 = vld [vmem:[#allocation2 + $0xa2c] ss:$16 sps:$4 sm:$0xff]   ;;  %v5523_v61 = vld [vmem:[#allocation2 + $0x828] ss:$16 sps:$4 sm:$0xff]  }
 0x1a3   :  { %3718 = vmatpush2.bf16.msra.mxu0 %v5457_v62  ;;  %v5526_v62 = vld [vmem:[#allocation2 + $0xa28] ss:$16 sps:$4 sm:$0xff]  }
 0x1a4   :  { %3759 = vmatpush2.bf16.msra.mxu1 %v5460_v63  ;;  %3719 = vmatprep.subr.bf16.mxu0 %v5465_v1  ;;  %v5531_v63 = vld [vmem:[#allocation2 + $0x80c] ss:$16 sps:$4 sm:$0xff]  }
 0x1a5   :  { %3760 = vmatprep.subr.bf16.mxu1 %v5468_v2  ;;  %v5534_v1 = vld [vmem:[#allocation2 + $0xa0c] ss:$16 sps:$4 sm:$0xff]   ;;  %v5529_v2 = vld [vmem:[#allocation2 + $0x808] ss:$16 sps:$4 sm:$0xff]  }
 0x1a7   :  { %3720 = vmatpush2.bf16.msra.mxu0 %v5463_v3  ;;  %v5532_v3 = vld [vmem:[#allocation2 + $0xa08] ss:$16 sps:$4 sm:$0xff]  }
 0x1a8   :  { %3761 = vmatpush2.bf16.msra.mxu1 %v5466_v4  ;;  %3721 = vmatprep.subr.bf16.mxu0 %v5471_v5  ;;  %v5537_v4 = vld [vmem:[#allocation2 + $0x9ec] ss:$16 sps:$4 sm:$0xff]  }
 0x1a9   :  { %3762 = vmatprep.subr.bf16.mxu1 %v5474_v7  ;;  %v5540_v5 = vld [vmem:[#allocation2 + $0xbec] ss:$16 sps:$4 sm:$0xff]   ;;  %v5535_v7 = vld [vmem:[#allocation2 + $0x9e8] ss:$16 sps:$4 sm:$0xff]  }
 0x1ab   :  { %3722 = vmatpush2.bf16.msra.mxu0 %v5469_v8  ;;  %v5538_v8 = vld [vmem:[#allocation2 + $0xbe8] ss:$16 sps:$4 sm:$0xff]  }
 0x1ac   :  { %3763 = vmatpush2.bf16.msra.mxu1 %v5472_v9  ;;  %3723 = vmatprep.subr.bf16.mxu0 %v5477_v12  ;;  %v5543_v9 = vld [vmem:[#allocation2 + $0x9cc] ss:$16 sps:$4 sm:$0xff]  }
 0x1ad   :  { %3764 = vmatprep.subr.bf16.mxu1 %v5480_v14  ;;  %v5546_v12 = vld [vmem:[#allocation2 + $0xbcc] ss:$16 sps:$4 sm:$0xff]   ;;  %v5541_v14 = vld [vmem:[#allocation2 + $0x9c8] ss:$16 sps:$4 sm:$0xff]  }
 0x1af   :  { %3724 = vmatpush2.bf16.msra.mxu0 %v5475_v15  ;;  %v5544_v15 = vld [vmem:[#allocation2 + $0xbc8] ss:$16 sps:$4 sm:$0xff]  }
 0x1b0   :  { %3765 = vmatpush2.bf16.msra.mxu1 %v5478_v13  ;;  %3725 = vmatprep.subr.bf16.mxu0 %v5483_v18  ;;  %v5549_v13 = vld [vmem:[#allocation2 + $0x9ac] ss:$16 sps:$4 sm:$0xff]  }
 0x1b1   :  { %3766 = vmatprep.subr.bf16.mxu1 %v5486_v16  ;;  %v5552_v18 = vld [vmem:[#allocation2 + $0xbac] ss:$16 sps:$4 sm:$0xff]   ;;  %v5547_v16 = vld [vmem:[#allocation2 + $0x9a8] ss:$16 sps:$4 sm:$0xff]  }
 0x1b3   :  { %3726 = vmatpush2.bf16.msra.mxu0 %v5481_v20  ;;  %v5550_v20 = vld [vmem:[#allocation2 + $0xba8] ss:$16 sps:$4 sm:$0xff]  }
 0x1b4   :  { %3767 = vmatpush2.bf16.msra.mxu1 %v5484_v49  ;;  %3777 = vmatprep.subr.bf16.mxu0 %v5489_v40  ;;  %v5555_v49 = vld [vmem:[#allocation2 + $0x98c] ss:$16 sps:$4 sm:$0xff]  }
 0x1b5   :  { %3818 = vmatprep.subr.bf16.mxu1 %v5492_v47  ;;  %v5558_v40 = vld [vmem:[#allocation2 + $0xb8c] ss:$16 sps:$4 sm:$0xff]   ;;  %v5553_v47 = vld [vmem:[#allocation2 + $0x988] ss:$16 sps:$4 sm:$0xff]  }
 0x1b6   :  { %v3483_v24 = vpop.f32.mrf.mxu0  ;;  %3728 = vmatmul.mubr.bf16.vlgmr.msra.gmra.mxu0 %v5915_v26 }
 0x1b7   :  { %v3524_v25 = vpop.f32.mrf.mxu1  ;;  %3769 = vmatmul.mubr.bf16.vlgmr.msra.gmra.mxu1 %v5919_v30  ;;  %v3484_v27 = vadd.f32 %v3483_v24, %v5990_v11  ;;  %3778 = vmatpush1.bf16.msra.mxu0 %v5487_v21  ;;  %v5556_v21 = vld [vmem:[#allocation2 + $0xb88] ss:$16 sps:$4 sm:$0xff]  }
 0x1b8   :  { %3819 = vmatpush1.bf16.msra.mxu1 %v5490_v17  ;;  %v3485_v31 = vpop.f32.mrf.mxu0  ;;  %3779 = vmatprep.subr.bf16.mxu0 %v5495_v23  ;;  %v5561_v17 = vld [vmem:[#allocation2 + $0x96c] ss:$16 sps:$4 sm:$0xff]   ;;  %v5562_v24 = vld [vmem:[#allocation2 + $0xb68] ss:$16 sps:$4 sm:$0xff]  }
 0x1b9   :  { %v3526_v32 = vpop.f32.mrf.mxu1  ;;  %3820 = vmatprep.subr.bf16.mxu1 %v5498_v22  ;;  %v6000_v36 = vadd.f32 %v3524_v25, %v3484_v27  ;;  %v3486_v38 = vadd.f32 %v3485_v31, %v5995_v37  ;;  %3809 = vmatprep.mubr.bf16.mxu0 %v5935_v41  ;;  %v5505_v37 = vld [vmem:[#allocation2 + $0x888] ss:$16 sps:$4 sm:$0xff]   ;;  %v5564_v23 = vld [vmem:[#allocation2 + $0xb6c] ss:$16 sps:$4 sm:$0xff]  }
 0x1ba   :  { %3850 = vmatprep.mubr.bf16.mxu1 %v5940_v43  ;;  %v3487_v26 = vpop.f32.mrf.mxu0  ;;  %v5508_v41 = vld [vmem:[#allocation2 + $0xa88] ss:$16 sps:$4 sm:$0xff]   ;;  %v5513_v43 = vld [vmem:[#allocation2 + $0x86c] ss:$16 sps:$4 sm:$0xff]  }
 0x1bb   :  { %v3528_v30 = vpop.f32.mrf.mxu1  ;;  %v6005_v11 = vadd.f32 %v3526_v32, %v3486_v38  ;;  %3780 = vmatpush1.bf16.msra.mxu0 %v5493_v28  ;;  %v5559_v22 = vld [vmem:[#allocation2 + $0x968] ss:$16 sps:$4 sm:$0xff]   ;;  %v5567_v25 = vld [vmem:[#allocation2 + $0x94c] ss:$16 sps:$4 sm:$0xff]  }
 0x1bc   :  { %3821 = vmatpush1.bf16.msra.mxu1 %v5496_v29  ;;  %v3488_v45 = vpop.f32.mrf.mxu0  ;;  %3781 = vmatprep.subr.bf16.mxu0 %v5501_v33  ;;  %v5570_v27 = vld [vmem:[#allocation2 + $0xb4c] ss:$16 sps:$4 sm:$0xff]   ;;  %v5565_v28 = vld [vmem:[#allocation2 + $0x948] ss:$16 sps:$4 sm:$0xff]  }
 0x1bd   :  { %v3529_v46 = vpop.f32.mrf.mxu1  ;;  %3822 = vmatprep.subr.bf16.mxu1 %v5504_v34  ;;  %v5568_v29 = vld [vmem:[#allocation2 + $0xb48] ss:$16 sps:$4 sm:$0xff]   ;;  %v5573_v31 = vld [vmem:[#allocation2 + $0x92c] ss:$16 sps:$4 sm:$0xff]  }
 0x1be   :  { %v5576_v32 = vld [vmem:[#allocation2 + $0xb2c] ss:$16 sps:$4 sm:$0xff]   ;;  %v5571_v33 = vld [vmem:[#allocation2 + $0x928] ss:$16 sps:$4 sm:$0xff]  }
 0x1bf   :  { %3782 = vmatpush1.bf16.msra.mxu0 %v5499_v39  ;;  %v5574_v34 = vld [vmem:[#allocation2 + $0xb28] ss:$16 sps:$4 sm:$0xff]   ;;  %v5579_v38 = vld [vmem:[#allocation2 + $0x90c] ss:$16 sps:$4 sm:$0xff]  }
 0x1c0   :  { %3823 = vmatpush1.bf16.msra.mxu1 %v5502_v44  ;;  %3783 = vmatprep.subr.bf16.mxu0 %v5507_v6  ;;  %v5582_v26 = vld [vmem:[#allocation2 + $0xb0c] ss:$16 sps:$4 sm:$0xff]   ;;  %v5577_v30 = vld [vmem:[#allocation2 + $0x908] ss:$16 sps:$4 sm:$0xff]  }
 0x1c1   :  { %3824 = vmatprep.subr.bf16.mxu1 %v5510_v48  ;;  %v5580_v39 = vld [vmem:[#allocation2 + $0xb08] ss:$16 sps:$4 sm:$0xff]   ;;  %v5585_v44 = vld [vmem:[#allocation2 + $0xcec] ss:$16 sps:$4 sm:$0xff]  }
 0x1c2   :  { %v5588_v45 = vld [vmem:[#allocation2 + $0xeec] ss:$16 sps:$4 sm:$0xff]   ;;  %v5583_v46 = vld [vmem:[#allocation2 + $0xce8] ss:$16 sps:$4 sm:$0xff]  }
 0x1c3   :  { %3784 = vmatpush1.bf16.msra.mxu0 %v5505_v37  ;;  %v5586_v6 = vld [vmem:[#allocation2 + $0xee8] ss:$16 sps:$4 sm:$0xff]   ;;  %v5591_v48 = vld [vmem:[#allocation2 + $0xccc] ss:$16 sps:$4 sm:$0xff]  }
 0x1c4   :  { %3825 = vmatpush1.bf16.msra.mxu1 %v5508_v41  ;;  %3785 = vmatprep.subr.bf16.mxu0 %v5513_v43  ;;  %v5594_v37 = vld [vmem:[#allocation2 + $0xecc] ss:$16 sps:$4 sm:$0xff]  }
 0x1c5   :  { %3826 = vmatprep.subr.bf16.mxu1 %v5516_v51 }
 0x1c7   :  { %3786 = vmatpush1.bf16.msra.mxu0 %v5511_v52  ;;  %v5589_v52 = vld [vmem:[#allocation2 + $0xcc8] ss:$16 sps:$4 sm:$0xff]  }
 0x1c8   :  { %3827 = vmatpush1.bf16.msra.mxu1 %v5514_v53  ;;  %3787 = vmatprep.subr.bf16.mxu0 %v5519_v56  ;;  %v5592_v53 = vld [vmem:[#allocation2 + $0xec8] ss:$16 sps:$4 sm:$0xff]  }
 0x1c9   :  { %3828 = vmatprep.subr.bf16.mxu1 %v5522_v60 }
 0x1cb   :  { %3788 = vmatpush1.bf16.msra.mxu0 %v5517_v0  ;;  %v5597_v0 = vld [vmem:[#allocation2 + $0xcac] ss:$16 sps:$4 sm:$0xff]  }
 0x1cc   :  { %3829 = vmatpush1.bf16.msra.mxu1 %v5520_v57  ;;  %3789 = vmatprep.subr.bf16.mxu0 %v5525_v35  ;;  %v5600_v57 = vld [vmem:[#allocation2 + $0xeac] ss:$16 sps:$4 sm:$0xff]  }
 0x1cd   :  { %3830 = vmatprep.subr.bf16.mxu1 %v5528_v58  ;;  %v5598_v58 = vld [vmem:[#allocation2 + $0xea8] ss:$16 sps:$4 sm:$0xff]  }
 0x1cf   :  { %3790 = vmatpush1.bf16.msra.mxu0 %v5523_v61 }
 0x1d0   :  { %3831 = vmatpush1.bf16.msra.mxu1 %v5526_v62  ;;  %3791 = vmatprep.subr.bf16.mxu0 %v5531_v63  ;;  %v5603_v63 = vld [vmem:[#allocation2 + $0xc8c] ss:$16 sps:$4 sm:$0xff]  }
 0x1d1   :  { %3832 = vmatprep.subr.bf16.mxu1 %v5534_v1  ;;  %v5606_v1 = vld [vmem:[#allocation2 + $0xe8c] ss:$16 sps:$4 sm:$0xff]  }
 0x1d3   :  { %3792 = vmatpush1.bf16.msra.mxu0 %v5529_v2  ;;  %v5601_v2 = vld [vmem:[#allocation2 + $0xc88] ss:$16 sps:$4 sm:$0xff]  }
 0x1d4   :  { %3833 = vmatpush1.bf16.msra.mxu1 %v5532_v3  ;;  %3793 = vmatprep.subr.bf16.mxu0 %v5537_v4  ;;  %v5604_v3 = vld [vmem:[#allocation2 + $0xe88] ss:$16 sps:$4 sm:$0xff]  }
 0x1d5   :  { %3834 = vmatprep.subr.bf16.mxu1 %v5540_v5  ;;  %v5607_v4 = vld [vmem:[#allocation2 + $0xc68] ss:$16 sps:$4 sm:$0xff]  }
 0x1d6   :  { %v5610_v5 = vld [vmem:[#allocation2 + $0xe68] ss:$16 sps:$4 sm:$0xff]  }
 0x1d7   :  { %3794 = vmatpush2.bf16.msra.mxu0 %v5535_v7  ;;  %v5615_v7 = vld [vmem:[#allocation2 + $0xc4c] ss:$16 sps:$4 sm:$0xff]  }
 0x1d8   :  { %3835 = vmatpush2.bf16.msra.mxu1 %v5538_v8  ;;  %3795 = vmatprep.subr.bf16.mxu0 %v5543_v9  ;;  %v5618_v8 = vld [vmem:[#allocation2 + $0xe4c] ss:$16 sps:$4 sm:$0xff]   ;;  %v5613_v9 = vld [vmem:[#allocation2 + $0xc48] ss:$16 sps:$4 sm:$0xff]  }
 0x1d9   :  { %3836 = vmatprep.subr.bf16.mxu1 %v5546_v12  ;;  %v5616_v12 = vld [vmem:[#allocation2 + $0xe48] ss:$16 sps:$4 sm:$0xff]  }
 0x1db   :  { %3796 = vmatpush2.bf16.msra.mxu0 %v5541_v14  ;;  %v5621_v14 = vld [vmem:[#allocation2 + $0xc2c] ss:$16 sps:$4 sm:$0xff]  }
 0x1dc   :  { %3837 = vmatpush2.bf16.msra.mxu1 %v5544_v15  ;;  %3797 = vmatprep.subr.bf16.mxu0 %v5549_v13  ;;  %v5624_v15 = vld [vmem:[#allocation2 + $0xe2c] ss:$16 sps:$4 sm:$0xff]   ;;  %v5619_v13 = vld [vmem:[#allocation2 + $0xc28] ss:$16 sps:$4 sm:$0xff]  }
 0x1dd   :  { %3838 = vmatprep.subr.bf16.mxu1 %v5552_v18  ;;  %v5622_v18 = vld [vmem:[#allocation2 + $0xe28] ss:$16 sps:$4 sm:$0xff]  }
 0x1df   :  { %3798 = vmatpush2.bf16.msra.mxu0 %v5547_v16  ;;  %v5627_v16 = vld [vmem:[#allocation2 + $0xc0c] ss:$16 sps:$4 sm:$0xff]  }
 0x1e0   :  { %3839 = vmatpush2.bf16.msra.mxu1 %v5550_v20  ;;  %3799 = vmatprep.subr.bf16.mxu0 %v5555_v49  ;;  %v5630_v20 = vld [vmem:[#allocation2 + $0xe0c] ss:$16 sps:$4 sm:$0xff]   ;;  %v5625_v49 = vld [vmem:[#allocation2 + $0xc08] ss:$16 sps:$4 sm:$0xff]  }
 0x1e1   :  { %3840 = vmatprep.subr.bf16.mxu1 %v5558_v40  ;;  %v5628_v40 = vld [vmem:[#allocation2 + $0xe08] ss:$16 sps:$4 sm:$0xff]  }
 0x1e3   :  { %3800 = vmatpush2.bf16.msra.mxu0 %v5553_v47  ;;  %v5633_v47 = vld [vmem:[#allocation2 + $0xdec] ss:$16 sps:$4 sm:$0xff]  }
 0x1e4   :  { %3841 = vmatpush2.bf16.msra.mxu1 %v5556_v21  ;;  %3801 = vmatprep.subr.bf16.mxu0 %v5561_v17  ;;  %v5636_v21 = vld [vmem:[#allocation2 + $0xfec] ss:$16 sps:$4 sm:$0xff]   ;;  %v5631_v17 = vld [vmem:[#allocation2 + $0xde8] ss:$16 sps:$4 sm:$0xff]  }
 0x1e5   :  { %3842 = vmatprep.subr.bf16.mxu1 %v5564_v23  ;;  %v5634_v23 = vld [vmem:[#allocation2 + $0xfe8] ss:$16 sps:$4 sm:$0xff]  }
 0x1e7   :  { %3802 = vmatpush2.bf16.msra.mxu0 %v5559_v22  ;;  %v5639_v22 = vld [vmem:[#allocation2 + $0xdcc] ss:$16 sps:$4 sm:$0xff]  }
 0x1e8   :  { %3843 = vmatpush2.bf16.msra.mxu1 %v5562_v24  ;;  %3803 = vmatprep.subr.bf16.mxu0 %v5567_v25  ;;  %v5642_v24 = vld [vmem:[#allocation2 + $0xfcc] ss:$16 sps:$4 sm:$0xff]   ;;  %v5637_v25 = vld [vmem:[#allocation2 + $0xdc8] ss:$16 sps:$4 sm:$0xff]  }
 0x1e9   :  { %3844 = vmatprep.subr.bf16.mxu1 %v5570_v27  ;;  %v5640_v27 = vld [vmem:[#allocation2 + $0xfc8] ss:$16 sps:$4 sm:$0xff]  }
 0x1eb   :  { %3804 = vmatpush2.bf16.msra.mxu0 %v5565_v28  ;;  %v5645_v28 = vld [vmem:[#allocation2 + $0xdac] ss:$16 sps:$4 sm:$0xff]  }
 0x1ec   :  { %3845 = vmatpush2.bf16.msra.mxu1 %v5568_v29  ;;  %3805 = vmatprep.subr.bf16.mxu0 %v5573_v31  ;;  %v5648_v29 = vld [vmem:[#allocation2 + $0xfac] ss:$16 sps:$4 sm:$0xff]   ;;  %v5643_v31 = vld [vmem:[#allocation2 + $0xda8] ss:$16 sps:$4 sm:$0xff]  }
 0x1ed   :  { %3846 = vmatprep.subr.bf16.mxu1 %v5576_v32  ;;  %v5646_v32 = vld [vmem:[#allocation2 + $0xfa8] ss:$16 sps:$4 sm:$0xff]  }
 0x1ef   :  { %3806 = vmatpush2.bf16.msra.mxu0 %v5571_v33  ;;  %v5651_v33 = vld [vmem:[#allocation2 + $0xd8c] ss:$16 sps:$4 sm:$0xff]  }
 0x1f0   :  { %3847 = vmatpush2.bf16.msra.mxu1 %v5574_v34  ;;  %3807 = vmatprep.subr.bf16.mxu0 %v5579_v38  ;;  %v5654_v34 = vld [vmem:[#allocation2 + $0xf8c] ss:$16 sps:$4 sm:$0xff]   ;;  %v5649_v38 = vld [vmem:[#allocation2 + $0xd88] ss:$16 sps:$4 sm:$0xff]  }
 0x1f1   :  { %3848 = vmatprep.subr.bf16.mxu1 %v5582_v26  ;;  %v5652_v26 = vld [vmem:[#allocation2 + $0xf88] ss:$16 sps:$4 sm:$0xff]  }
 0x1f3   :  { %3808 = vmatpush2.bf16.msra.mxu0 %v5577_v30  ;;  %v5657_v30 = vld [vmem:[#allocation2 + $0xd6c] ss:$16 sps:$4 sm:$0xff]  }
 0x1f4   :  { %3849 = vmatpush2.bf16.msra.mxu1 %v5580_v39  ;;  %3859 = vmatprep.subr.bf16.mxu0 %v5585_v44  ;;  %v5660_v39 = vld [vmem:[#allocation2 + $0xf6c] ss:$16 sps:$4 sm:$0xff]   ;;  %v5655_v44 = vld [vmem:[#allocation2 + $0xd68] ss:$16 sps:$4 sm:$0xff]  }
 0x1f5   :  { %3900 = vmatprep.subr.bf16.mxu1 %v5588_v45  ;;  %v5658_v45 = vld [vmem:[#allocation2 + $0xf68] ss:$16 sps:$4 sm:$0xff]  }
 0x1f6   :  { %v3565_v41 = vpop.f32.mrf.mxu0  ;;  %3810 = vmatmul.mubr.bf16.vlgmr.msra.gmra.mxu0 %v5952_v50 }
 0x1f7   :  { %v3606_v43 = vpop.f32.mrf.mxu1  ;;  %3851 = vmatmul.mubr.bf16.vlgmr.msra.gmra.mxu1 %v5959_v55  ;;  %v3566_v51 = vadd.f32 %v3565_v41, %v6000_v36  ;;  %3860 = vmatpush1.bf16.msra.mxu0 %v5583_v46  ;;  %v5595_v36 = vld [vmem:[#allocation2 + $0xca8] ss:$16 sps:$4 sm:$0xff]   ;;  %v5663_v46 = vld [vmem:[#allocation2 + $0xd4c] ss:$16 sps:$4 sm:$0xff]  }
 0x1f8   :  { %3901 = vmatpush1.bf16.msra.mxu1 %v5586_v6  ;;  %v6010_v56 = vpop.f32.mrf.mxu0  ;;  %3861 = vmatprep.subr.bf16.mxu0 %v5591_v48  ;;  %v5666_v6 = vld [vmem:[#allocation2 + $0xf4c] ss:$16 sps:$4 sm:$0xff]   ;;  %v5661_v48 = vld [vmem:[#allocation2 + $0xd48] ss:$16 sps:$4 sm:$0xff]  }
 0x1f9   :  { %v6012_v60 = vpop.f32.mrf.mxu1  ;;  %3902 = vmatprep.subr.bf16.mxu1 %v5594_v37  ;;  %v6014_v35 = vadd.f32 %v3606_v43, %v3566_v51  ;;  %3891 = vmatprep.mubr.bf16.mxu0 %v5955_v54  ;;  %v5609_v54 = vld [vmem:[#allocation2 + $0xc6c] ss:$16 sps:$4 sm:$0xff]   ;;  %v5664_v37 = vld [vmem:[#allocation2 + $0xf48] ss:$16 sps:$4 sm:$0xff]   ;;  %v3568_v51 = vadd.f32 %v6010_v56, %v6005_v11  ;;  %v603_v56 = vsub.s32 3, %v5872_v42 }
 0x1fa   :  { %3932 = vmatprep.mubr.bf16.mxu1 %v5963_v59  ;;  %v3569_v50 = vpop.f32.mrf.mxu0  ;;  %v5612_v59 = vld [vmem:[#allocation2 + $0xe6c] ss:$16 sps:$4 sm:$0xff]  }
 0x1fb   :  { %v3610_v55 = vpop.f32.mrf.mxu1  ;;  %3862 = vmatpush1.bf16.msra.mxu0 %v5589_v52  ;;  %v5669_v41 = vld [vmem:[#allocation2 + $0xd2c] ss:$16 sps:$4 sm:$0xff]   ;;  %v5667_v52 = vld [vmem:[#allocation2 + $0xd28] ss:$16 sps:$4 sm:$0xff]   ;;  %v3609_v50 = vadd.f32 %v6012_v60, %v3568_v51 }
 0x1fc   :  { %3903 = vmatpush1.bf16.msra.mxu1 %v5592_v53  ;;  %v3570_v61 = vpop.f32.mrf.mxu0  ;;  %3863 = vmatprep.subr.bf16.mxu0 %v5597_v0  ;;  %v5672_v43 = vld [vmem:[#allocation2 + $0xf2c] ss:$16 sps:$4 sm:$0xff]   ;;  %v5670_v53 = vld [vmem:[#allocation2 + $0xf28] ss:$16 sps:$4 sm:$0xff]  }
 0x1fd   :  { %v3611_v62 = vpop.f32.mrf.mxu1  ;;  %3904 = vmatprep.subr.bf16.mxu1 %v5600_v57  ;;  %v5675_v0 = vld [vmem:[#allocation2 + $0xd0c] ss:$16 sps:$4 sm:$0xff]   ;;  %v5673_v55 = vld [vmem:[#allocation2 + $0xd08] ss:$16 sps:$4 sm:$0xff]   ;;  %v3942_v11 = vmax.f32 %v3609_v50, 0.0 }
 0x1fe   :  { %v5678_v57 = vld [vmem:[#allocation2 + $0xf0c] ss:$16 sps:$4 sm:$0xff]   ;;  %v5711_v62 = vld [vmem:[#allocation5] sm:$0xf] }
 0x1ff   :  { %3864 = vmatpush1.bf16.msra.mxu0 %v5595_v36  ;;  %v5676_v36 = vld [vmem:[#allocation2 + $0xf08] ss:$16 sps:$4 sm:$0xff]   ;;  %v5679_v61 = vld [vmem:[#allocation7 + $0x78] sm:$0xff]   ;;  %v3946_v60 = vpack.c.bf16 %v3942_v11, %v3942_v11 }
 0x200   :  { %3905 = vmatpush1.bf16.msra.mxu1 %v5598_v58  ;;  %3865 = vmatprep.subr.bf16.mxu0 %v5603_v63  ;;  %v599_v58 = vsub.s32 2, %v5872_v42 }
 0x201   :  { %3906 = vmatprep.subr.bf16.mxu1 %v5606_v1  ;;  %v5680_v1 = vld [vmem:[#allocation7 + $0x38] sm:$0xff]  }
 0x202   :  { %v600_v63 = vrot.slane %v5711_v62, %v599_v58  ;;  %v5710_v58 = vld [vmem:[#allocation7 + $0x80] sm:$0xff]  }
 0x203   :  { %3866 = vmatpush1.bf16.msra.mxu0 %v5601_v2  ;;  %v5681_v2 = vld [vmem:[#allocation7 + $0x70] sm:$0xff]  }
 0x204   :  { %3907 = vmatpush1.bf16.msra.mxu1 %v5604_v3  ;;  %3867 = vmatprep.subr.bf16.mxu0 %v5609_v54  ;;  %v604_v3 = vrot.slane %v5711_v62, %v603_v56 }
 0x205   :  { %3908 = vmatprep.subr.bf16.mxu1 %v5612_v59 }
 0x207   :  { %3868 = vmatpush1.bf16.msra.mxu0 %v5607_v4 }
 0x208   :  { %3909 = vmatpush1.bf16.msra.mxu1 %v5610_v5  ;;  %3869 = vmatprep.subr.bf16.mxu0 %v5615_v7  ;;  %v5682_v5 = vld [vmem:[#allocation7 + $0x30] sm:$0xff]  }
 0x209   :  { %3910 = vmatprep.subr.bf16.mxu1 %v5618_v8  ;;  %v5683_v8 = vld [vmem:[#allocation7 + $0x68] sm:$0xff]  }
 0x20b   :  { %3870 = vmatpush1.bf16.msra.mxu0 %v5613_v9 }
 0x20c   :  { %3911 = vmatpush1.bf16.msra.mxu1 %v5616_v12  ;;  %3871 = vmatprep.subr.bf16.mxu0 %v5621_v14 }
 0x20d   :  { %3912 = vmatprep.subr.bf16.mxu1 %v5624_v15 }
 0x20f   :  { %3872 = vmatpush1.bf16.msra.mxu0 %v5619_v13 }
 0x210   :  { %3913 = vmatpush1.bf16.msra.mxu1 %v5622_v18  ;;  %3873 = vmatprep.subr.bf16.mxu0 %v5627_v16  ;;  %v5684_v18 = vld [vmem:[#allocation7 + $0x28] sm:$0xff]   ;;  %v5685_v16 = vld [vmem:[#allocation7 + $0x60] sm:$0xff]  }
 0x211   :  { %3914 = vmatprep.subr.bf16.mxu1 %v5630_v20 }
 0x213   :  { %3874 = vmatpush1.bf16.msra.mxu0 %v5625_v49  ;;  %v5696_v49 = vld [vmem:[#allocation7 + $0xb8] sm:$0xff]  }
 0x214   :  { %3915 = vmatpush1.bf16.msra.mxu1 %v5628_v40  ;;  %3875 = vmatprep.subr.bf16.mxu0 %v5633_v47  ;;  %v5697_v40 = vld [vmem:[#allocation7 + $0xf0] sm:$0xff]   ;;  %v5686_v47 = vld [vmem:[#allocation7 + $0x20] sm:$0xff]  }
 0x215   :  { %3916 = vmatprep.subr.bf16.mxu1 %v5636_v21  ;;  %v5698_v21 = vld [vmem:[#allocation7 + $0xb0] sm:$0xff]  }
 0x217   :  { %3876 = vmatpush2.bf16.msra.mxu0 %v5631_v17  ;;  %v5687_v17 = vld [vmem:[#allocation7 + $0x58] sm:$0xff]  }
 0x218   :  { %3917 = vmatpush2.bf16.msra.mxu1 %v5634_v23  ;;  %3877 = vmatprep.subr.bf16.mxu0 %v5639_v22  ;;  %v5699_v23 = vld [vmem:[#allocation7 + $0xe8] sm:$0xff]   ;;  %v5688_v22 = vld [vmem:[#allocation7 + $0x18] sm:$0xff]  }
 0x219   :  { %3918 = vmatprep.subr.bf16.mxu1 %v5642_v24  ;;  %v5700_v24 = vld [vmem:[#allocation7 + $0xa8] sm:$0xff]  }
 0x21b   :  { %3878 = vmatpush2.bf16.msra.mxu0 %v5637_v25  ;;  %v5689_v25 = vld [vmem:[#allocation7 + $0x50] sm:$0xff]  }
 0x21c   :  { %3919 = vmatpush2.bf16.msra.mxu1 %v5640_v27  ;;  %3879 = vmatprep.subr.bf16.mxu0 %v5645_v28  ;;  %v5701_v27 = vld [vmem:[#allocation7 + $0xe0] sm:$0xff]   ;;  %v5690_v28 = vld [vmem:[#allocation7 + $0x10] sm:$0xff]  }
 0x21d   :  { %3920 = vmatprep.subr.bf16.mxu1 %v5648_v29  ;;  %v5702_v29 = vld [vmem:[#allocation7 + $0xa0] sm:$0xff]  }
 0x21f   :  { %3880 = vmatpush2.bf16.msra.mxu0 %v5643_v31  ;;  %v5691_v31 = vld [vmem:[#allocation7 + $0x48] sm:$0xff]  }
 0x220   :  { %3921 = vmatpush2.bf16.msra.mxu1 %v5646_v32  ;;  %3881 = vmatprep.subr.bf16.mxu0 %v5651_v33  ;;  %v5703_v32 = vld [vmem:[#allocation7 + $0xd8] sm:$0xff]   ;;  %v5692_v33 = vld [vmem:[#allocation7 + $0x8] sm:$0xff]  }
 0x221   :  { %3922 = vmatprep.subr.bf16.mxu1 %v5654_v34  ;;  %v5704_v34 = vld [vmem:[#allocation7 + $0x98] sm:$0xff]  }
 0x223   :  { %3882 = vmatpush2.bf16.msra.mxu0 %v5649_v38  ;;  %v5693_v38 = vld [vmem:[#allocation7 + $0x40] sm:$0xff]  }
 0x224   :  { %3923 = vmatpush2.bf16.msra.mxu1 %v5652_v26  ;;  %3883 = vmatprep.subr.bf16.mxu0 %v5657_v30  ;;  %v5694_v26 = vld [vmem:[#allocation7] sm:$0xff]   ;;  %v3941_v30 = vmax.f32 %v6014_v35, 0.0 }
 0x225   :  { %3924 = vmatprep.subr.bf16.mxu1 %v5660_v39 }
 0x226   :  { %v3945_v39 = vpack.c.bf16 %v3941_v30, %v3941_v30 }
 0x227   :  { %3884 = vmatpush2.bf16.msra.mxu0 %v5655_v44  ;;  %v5705_v44 = vld [vmem:[#allocation7 + $0xd0] sm:$0xff]  }
 0x228   :  { %3925 = vmatpush2.bf16.msra.mxu1 %v5658_v45  ;;  %3885 = vmatprep.subr.bf16.mxu0 %v5663_v46  ;;  %v5706_v45 = vld [vmem:[#allocation7 + $0x90] sm:$0xff]  }
 0x229   :  { %3926 = vmatprep.subr.bf16.mxu1 %v5666_v6 }
 0x22b   :  { %3886 = vmatpush2.bf16.msra.mxu0 %v5661_v48 }
 0x22c   :  { %3927 = vmatpush2.bf16.msra.mxu1 %v5664_v37  ;;  %3887 = vmatprep.subr.bf16.mxu0 %v5669_v41 }
 0x22d   :  { %3928 = vmatprep.subr.bf16.mxu1 %v5672_v43  ;;  %v5707_v43 = vld [vmem:[#allocation7 + $0xc8] sm:$0xff]  }
 0x22f   :  { %3888 = vmatpush2.bf16.msra.mxu0 %v5667_v52 }
 0x230   :  { %3929 = vmatpush2.bf16.msra.mxu1 %v5670_v53  ;;  %3889 = vmatprep.subr.bf16.mxu0 %v5675_v0  ;;  %v5708_v53 = vld [vmem:[#allocation7 + $0x88] sm:$0xff]  }
 0x231   :  { %3930 = vmatprep.subr.bf16.mxu1 %v5678_v57 }
 0x233   :  { %3890 = vmatpush2.bf16.msra.mxu0 %v5673_v55 }
 0x234   :  { %3931 = vmatpush2.bf16.msra.mxu1 %v5676_v36  ;;  %4855 = vmatprep.subr.bf16.mxu0 %v5679_v61  ;;  %v5709_v36 = vld [vmem:[#allocation7 + $0xc0] sm:$0xff]  }
 0x236   :  { %v3647_v54 = vpop.f32.mrf.mxu0  ;;  %3892 = vmatmul.mubr.bf16.vlgmr.msra.gmra.mxu0 %v5971_v10 }
 0x237   :  { %v3688_v59 = vpop.f32.mrf.mxu1  ;;  %3933 = vmatmul.mubr.bf16.vlgmr.msra.gmra.mxu1 %v5977_v19  ;;  %v3648_v4 = vadd.f32 %v3647_v54, %v600_v63  ;;  %4856 = vmatpush3.bf16.msra.mxu0 %v5680_v1  ;;  %v5695_v19 = vld [vmem:[#allocation7 + $0xf8] sm:$0xff]  }
 0x238   :  { %4244 = vmatprep.mubr.bf16.mxu0 %v3946_v60  ;;  %v3649_v42 = vpop.f32.mrf.mxu0  ;;  %4857 = vmatprep.subr.bf16.mxu0 %v5681_v2 }
 0x239   :  { %v3690_v7 = vpop.f32.mrf.mxu1  ;;  %v3689_v9 = vadd.f32 %v3688_v59, %v3648_v4  ;;  %v3650_v12 = vadd.f32 %v3649_v42, %v604_v3  ;;  %4877 = vmatprep.subr.bf16.mxu1 %v5695_v19 }
 0x23a   :  { %v3651_v14 = vpop.f32.mrf.mxu0  ;;  %4878 = vmatpush3.bf16.msra.mxu1 %v5696_v49 }
 0x23b   :  { %v3692_v15 = vpop.f32.mrf.mxu1  ;;  %v3691_v13 = vadd.f32 %v3690_v7, %v3650_v12  ;;  %4858 = vmatpush3.bf16.msra.mxu0 %v5682_v5  ;;  %4879 = vmatprep.subr.bf16.mxu1 %v5697_v40 }
 0x23c   :  { %v3652_v20 = vpop.f32.mrf.mxu0  ;;  %4859 = vmatprep.subr.bf16.mxu0 %v5683_v8 }
 0x23d   :  { %v3693_v10 = vpop.f32.mrf.mxu1 }
 0x23e   :  { %4880 = vmatpush3.bf16.msra.mxu1 %v5698_v21 }
 0x23f   :  { %4860 = vmatpush3.bf16.msra.mxu0 %v5684_v18  ;;  %4881 = vmatprep.subr.bf16.mxu1 %v5699_v23 }
 0x240   :  { %4861 = vmatprep.subr.bf16.mxu0 %v5685_v16 }
 0x242   :  { %4882 = vmatpush3.bf16.msra.mxu1 %v5700_v24  ;;  %v4822_v24 = vld [vmem:[#allocation8] ss:$0 sm:$0xff] }
 0x243   :  { %4862 = vmatpush3.bf16.msra.mxu0 %v5686_v47  ;;  %4883 = vmatprep.subr.bf16.mxu1 %v5701_v27 }
 0x244   :  { %4863 = vmatprep.subr.bf16.mxu0 %v5687_v17 }
 0x246   :  { %4884 = vmatpush3.bf16.msra.mxu1 %v5702_v29 }
 0x247   :  { %4864 = vmatpush3.bf16.msra.mxu0 %v5688_v22  ;;  %4885 = vmatprep.subr.bf16.mxu1 %v5703_v32 }
 0x248   :  { %4865 = vmatprep.subr.bf16.mxu0 %v5689_v25 }
 0x24a   :  { %4886 = vmatpush3.bf16.msra.mxu1 %v5704_v34 }
 0x24b   :  { %4866 = vmatpush3.bf16.msra.mxu0 %v5690_v28  ;;  %4887 = vmatprep.subr.bf16.mxu1 %v5705_v44 }
 0x24c   :  { %4867 = vmatprep.subr.bf16.mxu0 %v5691_v31 }
 0x24e   :  { %4888 = vmatpush3.bf16.msra.mxu1 %v5706_v45 }
 0x24f   :  { %4868 = vmatpush3.bf16.msra.mxu0 %v5692_v33  ;;  %4889 = vmatprep.subr.bf16.mxu1 %v5707_v43 }
 0x250   :  { %4869 = vmatprep.subr.bf16.mxu0 %v5693_v38 }
 0x252   :  { %4890 = vmatpush3.bf16.msra.mxu1 %v5708_v53 }
 0x253   :  { %4870 = vmatpush3.bf16.msra.mxu0 %v5694_v26  ;;  %4891 = vmatprep.subr.bf16.mxu1 %v5709_v36 }
 0x256   :  { %4245 = vmatmul.mubr.bf16.vlgmr.msra.gmra.mxu0 %v3945_v39  ;;  %4892 = vmatpush3.bf16.msra.mxu1 %v5710_v58 }
 0x276   :  { %v3729_v46 = vpop.f32.mrf.mxu0 }
 0x277   :  { %v3770_v6 = vpop.f32.mrf.mxu1  ;;  %v3730_v48 = vadd.f32 %v3729_v46, %v3689_v9 }
 0x278   :  { %v3731_v37 = vpop.f32.mrf.mxu0 }
 0x279   :  { %v3772_v41 = vpop.f32.mrf.mxu1  ;;  %v3771_v51 = vadd.f32 %v3770_v6, %v3730_v48  ;;  %v3732_v52 = vadd.f32 %v3731_v37, %v3691_v13 }
 0x27a   :  { %v3733_v0 = vpop.f32.mrf.mxu0 }
 0x27b   :  { %v3774_v57 = vpop.f32.mrf.mxu1  ;;  %v3773_v35 = vadd.f32 %v3772_v41, %v3732_v52 }
 0x27c   :  { %v3734_v50 = vpop.f32.mrf.mxu0 }
 0x27d   :  { %v3775_v55 = vpop.f32.mrf.mxu1 }
 0x2b6   :  { %v3811_v61 = vpop.f32.mrf.mxu0 }
 0x2b7   :  { %v3852_v11 = vpop.f32.mrf.mxu1  ;;  %v3812_v56 = vadd.f32 %v3811_v61, %v3771_v51 }
 0x2b8   :  { %v3813_v62 = vpop.f32.mrf.mxu0 }
 0x2b9   :  { %v3854_v63 = vpop.f32.mrf.mxu1  ;;  %v3853_v1 = vadd.f32 %v3852_v11, %v3812_v56  ;;  %v3814_v59 = vadd.f32 %v3813_v62, %v3773_v35 }
 0x2ba   :  { %v3815_v2 = vpop.f32.mrf.mxu0 }
 0x2bb   :  { %v3856_v60 = vpop.f32.mrf.mxu1  ;;  %v3855_v42 = vadd.f32 %v3854_v63, %v3814_v59 }
 0x2bc   :  { %v3816_v3 = vpop.f32.mrf.mxu0 }
 0x2bd   :  { %v3857_v54 = vpop.f32.mrf.mxu1 }
 0x2f6   :  { %v3893_v4 = vpop.f32.mrf.mxu0 }
 0x2f7   :  { %v3934_v5 = vpop.f32.mrf.mxu1  ;;  %v3894_v7 = vadd.f32 %v3893_v4, %v3853_v1 }
 0x2f8   :  { %v3895_v8 = vpop.f32.mrf.mxu0 }
 0x2f9   :  { %v3936_v9 = vpop.f32.mrf.mxu1  ;;  %v3935_v12 = vadd.f32 %v3934_v5, %v3894_v7  ;;  %v3896_v14 = vadd.f32 %v3895_v8, %v3855_v42 }
 0x2fa   :  { %v3897_v15 = vpop.f32.mrf.mxu0 }
 0x2fb   :  { %v3938_v13 = vpop.f32.mrf.mxu1  ;;  %v3937_v18 = vadd.f32 %v3936_v9, %v3896_v14  ;;  %v3943_v16 = vmax.f32 %v3935_v12, 0.0 }
 0x2fc   :  { %v3898_v20 = vpop.f32.mrf.mxu0 }
 0x2fd   :  { %v3939_v10 = vpop.f32.mrf.mxu1  ;;  %v3944_v19 = vmax.f32 %v3937_v18, 0.0  ;;  %v3947_v40 = vpack.c.bf16 %v3943_v16, %v3943_v16 }
 0x2ff   :  { %v3948_v49 = vpack.c.bf16 %v3944_v19, %v3944_v19 }
 0x301   :  { %4284 = vmatprep.mubr.bf16.mxu1 %v3948_v49 }
 0x302   :  { %4285 = vmatmul.mubr.bf16.vlgmr.msra.gmra.mxu1 %v3947_v40 }
 0x316   :  { %v4871_v47 = vpop.f32.mrf.mxu0 }
 0x318   :  { %v4872_v21 = vpop.f32.mrf.mxu0 }
 0x319   :  { %v4873_v17 = vadd.f32 %v4872_v21, %v4871_v47 }
 0x31a   :  { %v4874_v23 = vpop.f32.mrf.mxu0 }
 0x31b   :  { %v4247_v28 = vadd.f32 %v4873_v17, %v4822_v24 }
 0x31c   :  { %v4875_v22 = vpop.f32.mrf.mxu0 }
 0x3c2   :  { %v4893_v25 = vpop.f32.mrf.mxu1 }
 0x3c4   :  { %v4894_v27 = vpop.f32.mrf.mxu1 }
 0x3c5   :  { %v4895_v29 = vadd.f32 %v4894_v27, %v4893_v25 }
 0x3c6   :  { %v4896_v31 = vpop.f32.mrf.mxu1 }
 0x3c7   :  { %v4287_v32 = vadd.f32 %v4895_v29, %v4247_v28 }
 0x3c8   :  { %v4897_v33 = vpop.f32.mrf.mxu1 }
 0x3c9   :  { %4292 = vst [vmem:[#allocation10] sm:$0x3] %v4287_v32 }
 0x3ca   :  { %5803 = shalt.err (!%p5800_p10)
}
 0x3cb   :  { %4302 = dma.vmem_to_hbm [thread:$0]  %s4300_s18, 32, %s6034_s5, [#allocation4]  }
 0x3cc   :  { %5818 = dma.done.wait [#allocation4], 32  }
 0x3cd   :  { %5819 = vsyncadd [#allocation4], 4294967264 }
 0x3ce   :  { %4306 = vsyncpa [#allocation3], 1 }
 0x3cf   :  { %4307 = vsyncpa [#allocation6], 1 }
 0x3d0   :  { %4308 = vsyncpa [#allocation9], 1 }
 0x3d1   :  { %4309 = vsyncpa [#allocation4], 1 }

</bundles_post_ra>
